<compile_context>
chip_gen: v7x
topology: tpu7x:2x2x1
jax: 0.10.0
libtpu: 0.0.40
codegen_flags: <defaults>
</compile_context>

<pallas_src>
import functools

import jax
import jax.numpy as jnp
from jax.experimental import pallas as pl
from jax.experimental.pallas import tpu as pltpu


# ---------------------------------------------------------------------------
# small helpers
# ---------------------------------------------------------------------------

def _cmm(ar, ai, br, bi, a_sum=None, b_sum=None):
    """Complex matmul (ar + i*ai) @ (br + i*bi), 3-matmul (Karatsuba) form."""
    if a_sum is None:
        a_sum = ar + ai
    if b_sum is None:
        b_sum = br + bi
    t1 = jnp.dot(ar, br, preferred_element_type=jnp.float32)
    t2 = jnp.dot(ai, bi, preferred_element_type=jnp.float32)
    t3 = jnp.dot(a_sum, b_sum, preferred_element_type=jnp.float32)
    return t1 - t2, t3 - t1 - t2


# ---------------------------------------------------------------------------
# fused per-(batch, iteration) kernel
# ---------------------------------------------------------------------------

def _a_liknet_iter_kernel(w_ref,                                      # scalar prefetch (SMEM)
                          x0r_ref, x0i_ref,                           # (1, H, W)
                          y0r_ref, y0i_ref,                           # (1, C, H, W)  (== sub_ksp)
                          m_ref, sr_ref, si_ref,                      # (1, C, H, W)
                          fhr_ref, fhi_ref, fwtr_ref, fwti_ref,       # forward centered-DFT mats
                          ifhr_ref, ifhi_ref, ifwtr_ref, ifwti_ref,   # inverse centered-DFT mats
                          oyr_ref, oyi_ref, oxr_ref, oxi_ref,         # outputs
                          yr_c, yi_c, xr_c, xi_c):                    # VMEM carries
    it = pl.program_id(1)
    C, H, W = m_ref.shape[1], m_ref.shape[2], m_ref.shape[3]

    # Initialize the carried state at the first iteration of each batch element.
    @pl.when(it == 0)
    def _init():
        xr_c[...] = x0r_ref[0]
        xi_c[...] = x0i_ref[0]
        yr_c[...] = y0r_ref[0]
        yi_c[...] = y0i_ref[0]

    m = m_ref[0]                  # (C, H, W)
    subr = y0r_ref[0]             # sub_ksp == initial y (constants in the reference)
    subi = y0i_ref[0]
    sr = sr_ref[0]
    si = si_ref[0]

    # ---- KspNet[i]: its output is discarded by the reference -> no-op.
    # ---- ImgLrNet[i]: TODO(synk) ComplexAttentionLSNet not provided -> identity.

    # ---- ksp_dc:  y <- w*m*y + (1-w)*sub + (1-m)*y  ---------------------------
    w = w_ref[0]
    keep = (1.0 - m) + w * m
    yr_c[...] = keep * yr_c[...] + (1.0 - w) * subr
    yi_c[...] = keep * yi_c[...] + (1.0 - w) * subi

    # ---- DCGD:  x <- x + sum_c conj(s_c) * IFFT2c(m*(sub_c - m*FFT2c(s_c*x))) --
    xr = xr_c[...]
    xi = xi_c[...]

    # coil images = smaps * x (complex), broadcast x over the coil dim
    cr = sr * xr[None] - si * xi[None]            # (C, H, W)
    ci = sr * xi[None] + si * xr[None]

    fhr, fhi = fhr_ref[...], fhi_ref[...]
    fwtr, fwti = fwtr_ref[...], fwti_ref[...]
    ifhr, ifhi = ifhr_ref[...], ifhi_ref[...]
    ifwtr, ifwti = ifwtr_ref[...], ifwti_ref[...]
    fh_s, fwt_s = fhr + fhi, fwtr + fwti          # hoisted 3M operand sums
    ifh_s, ifwt_s = ifhr + ifhi, ifwtr + ifwti

    # forward W-side DFT: all coils batched into one (C*H, W) @ (W, W) matmul
    tr, ti = _cmm(cr.reshape(C * H, W), ci.reshape(C * H, W),
                  fwtr, fwti, b_sum=fwt_s)
    tr = tr.reshape(C, H, W)
    ti = ti.reshape(C, H, W)

    # per coil: forward H-side DFT, masked diff, inverse H-side DFT
    er_list, ei_list = [], []
    for c in range(C):
        kr, ki = _cmm(fhr, fhi, tr[c], ti[c], a_sum=fh_s)      # Fh @ (.)
        mc = m[c]
        dr = mc * (subr[c] - mc * kr)
        di = mc * (subi[c] - mc * ki)
        ur, ui = _cmm(ifhr, ifhi, dr, di, a_sum=ifh_s)         # IFh @ (.)
        er_list.append(ur)
        ei_list.append(ui)
    er = jnp.stack(er_list)                                    # (C, H, W)
    ei = jnp.stack(ei_list)

    # inverse W-side DFT, coil-batched
    ur, ui = _cmm(er.reshape(C * H, W), ei.reshape(C * H, W),
                  ifwtr, ifwti, b_sum=ifwt_s)
    ur = ur.reshape(C, H, W)
    ui = ui.reshape(C, H, W)

    # conj(smaps) * coil images, summed over coils; gradient-descent DC update
    xr_c[...] = xr + jnp.sum(sr * ur + si * ui, axis=0)
    xi_c[...] = xi + jnp.sum(sr * ui - si * ur, axis=0)

    # ---- ISL[i]: TODO(synk) InfoShareLayer not provided -> identity.

    # Write outputs to HBM only once per batch element (last iteration).
    @pl.when(it == pl.num_programs(1) - 1)
    def _finalize():
        oyr_ref[0] = yr_c[...]
        oyi_ref[0] = yi_c[...]
        oxr_ref[0] = xr_c[...]
        oxi_ref[0] = xi_c[...]


# ---------------------------------------------------------------------------
# glue: DFT matrices, pallas_call wrapper
# ---------------------------------------------------------------------------

def _centered_dft_mats(n):
    """Matrix of the centered, ortho-normalized DFT: fftshift(fft(ifftshift(.)))."""
    eye = jnp.eye(n, dtype=jnp.complex64)
    f = jnp.fft.fftshift(
        jnp.fft.fft(jnp.fft.ifftshift(eye, axes=0), axis=0, norm="ortho"), axes=0)
    finv = jnp.conj(f).T          # unitary -> inverse = conjugate transpose
    return f, finv


def a_liknet_forward(x, y_r, y_i, mask, smap_r, smap_i, num_iter=8):
    """Returns (y_real, y_imag, x) matching A_LIKNet.forward's (y, x) ordering."""
    B, H, W, _ = x.shape
    C = smap_r.shape[1]

    fh, ifh = _centered_dft_mats(H)
    fw, ifw = _centered_dft_mats(W)
    fwt, ifwt = fw.T, ifw.T
    as_f32 = lambda z: (jnp.real(z).astype(jnp.float32),
                        jnp.imag(z).astype(jnp.float32))
    fh_r, fh_i = as_f32(fh)
    ifh_r, ifh_i = as_f32(ifh)
    fwt_r, fwt_i = as_f32(fwt)
    ifwt_r, ifwt_i = as_f32(ifwt)

    # Scalar(init=0.5) — deterministic parameter init, lives in SMEM via prefetch.
    ksp_dc_weight = jnp.array([0.5], dtype=jnp.float32)

    # keep x as separate real/imag planes across the whole loop; stack only once.
    xr, xi = x[..., 0], x[..., 1]

    def img_map(b, it, w_ref):
        return (b, 0, 0)

    def coil_map(b, it, w_ref):
        return (b, 0, 0, 0)

    def mat_map(b, it, w_ref):
        return (0, 0)

    spec_img = pl.BlockSpec((1, H, W), img_map)
    spec_coil = pl.BlockSpec((1, C, H, W), coil_map)
    spec_h = pl.BlockSpec((H, H), mat_map)
    spec_w = pl.BlockSpec((W, W), mat_map)

    # Rough VMEM budget (double-buffered inputs/outputs + carries + matrices).
    # TODO(synk): on v7x (64 MiB VMEM) with large C,H,W, split the coil batch.
    coil_b = C * H * W * 4
    img_b = H * W * 4
    mat_b = 8 * (H * H + W * W) * 4
    est = 4 * (5 * coil_b + 2 * img_b) + 4 * (2 * coil_b + 2 * img_b) \
        + 2 * (coil_b + img_b) + 2 * mat_b
    vmem_limit = int(min(max(est, 32 * 1024 * 1024), 64 * 1024 * 1024))

    yr_o, yi_o, xr_o, xi_o = pl.pallas_call(
        _a_liknet_iter_kernel,
        out_shape=(jax.ShapeDtypeStruct((B, C, H, W), jnp.float32),
                   jax.ShapeDtypeStruct((B, C, H, W), jnp.float32),
                   jax.ShapeDtypeStruct((B, H, W), jnp.float32),
                   jax.ShapeDtypeStruct((B, H, W), jnp.float32)),
        grid_spec=pltpu.PrefetchScalarGridSpec(
            num_scalar_prefetch=1,                 # ksp_dc weight -> SMEM
            grid=(B, num_iter),                    # b outer (parallel), iter inner
            in_specs=[spec_img, spec_img,          # x real / imag
                      spec_coil, spec_coil,        # y0 (== sub_ksp) real / imag
                      spec_coil,                   # mask
                      spec_coil, spec_coil,        # smaps real / imag
                      spec_h, spec_h, spec_w, spec_w,      # Fh, FwT
                      spec_h, spec_h, spec_w, spec_w],     # IFh, IFwT
            out_specs=[spec_coil, spec_coil, spec_img, spec_img],
            scratch_shapes=[pltpu.VMEM((C, H, W), jnp.float32),  # y carry (r)
                            pltpu.VMEM((C, H, W), jnp.float32),  # y carry (i)
                            pltpu.VMEM((H, W), jnp.float32),     # x carry (r)
                            pltpu.VMEM((H, W), jnp.float32)]),   # x carry (i)
        compiler_params=pltpu.CompilerParams(
            dimension_semantics=("parallel", "arbitrary"),
            vmem_limit_bytes=vmem_limit),
    )(ksp_dc_weight, xr, xi, y_r, y_i, mask, smap_r, smap_i,
      fh_r, fh_i, fwt_r, fwt_i, ifh_r, ifh_i, ifwt_r, ifwt_i)

    x_out = jnp.stack([xr_o, xi_o], axis=-1)
    return yr_o, yi_o, x_out


# ---------------------------------------------------------------------------
# demo
# ---------------------------------------------------------------------------

if __name__ == "__main__":
    B, C, H, W = 2, 4, 16, 16

    key = jax.random.PRNGKey(0)
    k0, k1, k2, k3, k4, k5 = jax.random.split(key, 6)

    x = jax.random.normal(k0, (B, H, W, 2), dtype=jnp.float32)
    y_r = jax.random.normal(k1, (B, C, H, W), dtype=jnp.float32)
    y_i = jax.random.normal(k2, (B, C, H, W), dtype=jnp.float32)
    line_mask = (jax.random.uniform(k3, (1, 1, 1, W)) < 0.5).astype(jnp.float32)
    mask = jnp.ones((B, C, H, W), jnp.float32) * line_mask
    smap_r = jax.random.normal(k4, (B, C, H, W), dtype=jnp.float32)
    smap_i = jax.random.normal(k5, (B, C, H, W), dtype=jnp.float32)

    # sub-sampled k-space is zero outside the mask
    y_r = y_r * mask
    y_i = y_i * mask

    fwd = jax.jit(functools.partial(a_liknet_forward, num_iter=8))
    y_out_r, y_out_i, x_out = fwd(x, y_r, y_i, mask, smap_r, smap_i)
    jax.block_until_ready((y_out_r, y_out_i, x_out))
    print("KERNEL_OK")
</pallas_src>

<mosaic_0001>
module attributes {stable_mosaic.version = 11 : i64} {
  func.func @_a_liknet_iter_kernel(%arg0: i32, %arg1: i32, %arg2: memref<1xf32, #tpu.memory_space<smem>>, %arg3: memref<1x16x16xf32, #tpu.memory_space<vmem>>, %arg4: memref<1x16x16xf32, #tpu.memory_space<vmem>>, %arg5: memref<1x4x16x16xf32, #tpu.memory_space<vmem>>, %arg6: memref<1x4x16x16xf32, #tpu.memory_space<vmem>>, %arg7: memref<1x4x16x16xf32, #tpu.memory_space<vmem>>, %arg8: memref<1x4x16x16xf32, #tpu.memory_space<vmem>>, %arg9: memref<1x4x16x16xf32, #tpu.memory_space<vmem>>, %arg10: memref<16x16xf32, #tpu.memory_space<vmem>>, %arg11: memref<16x16xf32, #tpu.memory_space<vmem>>, %arg12: memref<16x16xf32, #tpu.memory_space<vmem>>, %arg13: memref<16x16xf32, #tpu.memory_space<vmem>>, %arg14: memref<16x16xf32, #tpu.memory_space<vmem>>, %arg15: memref<16x16xf32, #tpu.memory_space<vmem>>, %arg16: memref<16x16xf32, #tpu.memory_space<vmem>>, %arg17: memref<16x16xf32, #tpu.memory_space<vmem>>, %arg18: memref<1x4x16x16xf32, #tpu.memory_space<vmem>>, %arg19: memref<1x4x16x16xf32, #tpu.memory_space<vmem>>, %arg20: memref<1x16x16xf32, #tpu.memory_space<vmem>>, %arg21: memref<1x16x16xf32, #tpu.memory_space<vmem>>, %arg22: memref<4x16x16xf32, #tpu.memory_space<vmem>>, %arg23: memref<4x16x16xf32, #tpu.memory_space<vmem>>, %arg24: memref<16x16xf32, #tpu.memory_space<vmem>>, %arg25: memref<16x16xf32, #tpu.memory_space<vmem>>) attributes {dimension_semantics = [#tpu.dimension_semantics<parallel>, #tpu.dimension_semantics<arbitrary>], iteration_bounds = array<i64: 2, 8>, scalar_prefetch = 1 : i64, scratch_operands = 4 : i64, tpu.core_type = #tpu.core_type<tc>, window_params = [{transform_indices = @transform_0, window_bounds = array<i64: 1, 16, 16>}, {transform_indices = @transform_1, window_bounds = array<i64: 1, 16, 16>}, {transform_indices = @transform_2, window_bounds = array<i64: 1, 4, 16, 16>}, {transform_indices = @transform_3, window_bounds = array<i64: 1, 4, 16, 16>}, {transform_indices = @transform_4, window_bounds = array<i64: 1, 4, 16, 16>}, {transform_indices = @transform_5, window_bounds = array<i64: 1, 4, 16, 16>}, {transform_indices = @transform_6, window_bounds = array<i64: 1, 4, 16, 16>}, {pipeline_mode = #tpu.pipeline_mode<synchronous>, transform_indices = @transform_7, window_bounds = array<i64: 16, 16>}, {pipeline_mode = #tpu.pipeline_mode<synchronous>, transform_indices = @transform_8, window_bounds = array<i64: 16, 16>}, {pipeline_mode = #tpu.pipeline_mode<synchronous>, transform_indices = @transform_9, window_bounds = array<i64: 16, 16>}, {pipeline_mode = #tpu.pipeline_mode<synchronous>, transform_indices = @transform_10, window_bounds = array<i64: 16, 16>}, {pipeline_mode = #tpu.pipeline_mode<synchronous>, transform_indices = @transform_11, window_bounds = array<i64: 16, 16>}, {pipeline_mode = #tpu.pipeline_mode<synchronous>, transform_indices = @transform_12, window_bounds = array<i64: 16, 16>}, {pipeline_mode = #tpu.pipeline_mode<synchronous>, transform_indices = @transform_13, window_bounds = array<i64: 16, 16>}, {pipeline_mode = #tpu.pipeline_mode<synchronous>, transform_indices = @transform_14, window_bounds = array<i64: 16, 16>}, {transform_indices = @transform_15, window_bounds = array<i64: 1, 4, 16, 16>}, {transform_indices = @transform_16, window_bounds = array<i64: 1, 4, 16, 16>}, {transform_indices = @transform_17, window_bounds = array<i64: 1, 16, 16>}, {transform_indices = @transform_18, window_bounds = array<i64: 1, 16, 16>}]} {
    %c0_i32 = arith.constant 0 : i32
    %0 = arith.cmpi eq, %arg1, %c0_i32 : i32
    %1 = arith.extui %0 : i1 to i32
    %c0_i32_0 = arith.constant 0 : i32
    %2 = arith.cmpi ne, %1, %c0_i32_0 : i32
    scf.if %2 {
      %c0_92 = arith.constant 0 : index
      %c0_93 = arith.constant 0 : index
      %c0_94 = arith.constant 0 : index
      %228 = vector.load %arg3[%c0_92, %c0_93, %c0_94] : memref<1x16x16xf32, #tpu.memory_space<vmem>>, vector<1x16x16xf32>
      %229 = vector.shape_cast %228 : vector<1x16x16xf32> to vector<16x16xf32>
      %c0_95 = arith.constant 0 : index
      %c0_96 = arith.constant 0 : index
      %230 = vector.load %arg24[%c0_95, %c0_96] : memref<16x16xf32, #tpu.memory_space<vmem>>, vector<16x16xf32>
      tpu.vector_store %arg24[%c0_95, %c0_96], %229 {strides = array<i32>} : memref<16x16xf32, #tpu.memory_space<vmem>>, vector<16x16xf32>,
      %c0_97 = arith.constant 0 : index
      %c0_98 = arith.constant 0 : index
      %c0_99 = arith.constant 0 : index
      %231 = vector.load %arg4[%c0_97, %c0_98, %c0_99] : memref<1x16x16xf32, #tpu.memory_space<vmem>>, vector<1x16x16xf32>
      %232 = vector.shape_cast %231 : vector<1x16x16xf32> to vector<16x16xf32>
      %c0_100 = arith.constant 0 : index
      %c0_101 = arith.constant 0 : index
      %233 = vector.load %arg25[%c0_100, %c0_101] : memref<16x16xf32, #tpu.memory_space<vmem>>, vector<16x16xf32>
      tpu.vector_store %arg25[%c0_100, %c0_101], %232 {strides = array<i32>} : memref<16x16xf32, #tpu.memory_space<vmem>>, vector<16x16xf32>,
      %c0_102 = arith.constant 0 : index
      %c0_103 = arith.constant 0 : index
      %c0_104 = arith.constant 0 : index
      %c0_105 = arith.constant 0 : index
      %234 = vector.load %arg5[%c0_102, %c0_103, %c0_104, %c0_105] : memref<1x4x16x16xf32, #tpu.memory_space<vmem>>, vector<1x4x16x16xf32>
      %235 = vector.shape_cast %234 : vector<1x4x16x16xf32> to vector<4x16x16xf32>
      %c0_106 = arith.constant 0 : index
      %c0_107 = arith.constant 0 : index
      %c0_108 = arith.constant 0 : index
      %236 = vector.load %arg22[%c0_106, %c0_107, %c0_108] : memref<4x16x16xf32, #tpu.memory_space<vmem>>, vector<4x16x16xf32>
      tpu.vector_store %arg22[%c0_106, %c0_107, %c0_108], %235 {strides = array<i32>} : memref<4x16x16xf32, #tpu.memory_space<vmem>>, vector<4x16x16xf32>,
      %c0_109 = arith.constant 0 : index
      %c0_110 = arith.constant 0 : index
      %c0_111 = arith.constant 0 : index
      %c0_112 = arith.constant 0 : index
      %237 = vector.load %arg6[%c0_109, %c0_110, %c0_111, %c0_112] : memref<1x4x16x16xf32, #tpu.memory_space<vmem>>, vector<1x4x16x16xf32>
      %238 = vector.shape_cast %237 : vector<1x4x16x16xf32> to vector<4x16x16xf32>
      %c0_113 = arith.constant 0 : index
      %c0_114 = arith.constant 0 : index
      %c0_115 = arith.constant 0 : index
      %239 = vector.load %arg23[%c0_113, %c0_114, %c0_115] : memref<4x16x16xf32, #tpu.memory_space<vmem>>, vector<4x16x16xf32>
      tpu.vector_store %arg23[%c0_113, %c0_114, %c0_115], %238 {strides = array<i32>} : memref<4x16x16xf32, #tpu.memory_space<vmem>>, vector<4x16x16xf32>,
    } else {
    }
    %c0 = arith.constant 0 : index
    %c0_1 = arith.constant 0 : index
    %c0_2 = arith.constant 0 : index
    %c0_3 = arith.constant 0 : index
    %3 = vector.load %arg7[%c0, %c0_1, %c0_2, %c0_3] : memref<1x4x16x16xf32, #tpu.memory_space<vmem>>, vector<1x4x16x16xf32>
    %4 = vector.shape_cast %3 : vector<1x4x16x16xf32> to vector<4x16x16xf32>
    %c0_4 = arith.constant 0 : index
    %c0_5 = arith.constant 0 : index
    %c0_6 = arith.constant 0 : index
    %c0_7 = arith.constant 0 : index
    %5 = vector.load %arg5[%c0_4, %c0_5, %c0_6, %c0_7] : memref<1x4x16x16xf32, #tpu.memory_space<vmem>>, vector<1x4x16x16xf32>
    %6 = vector.shape_cast %5 : vector<1x4x16x16xf32> to vector<4x16x16xf32>
    %c0_8 = arith.constant 0 : index
    %c0_9 = arith.constant 0 : index
    %c0_10 = arith.constant 0 : index
    %c0_11 = arith.constant 0 : index
    %7 = vector.load %arg6[%c0_8, %c0_9, %c0_10, %c0_11] : memref<1x4x16x16xf32, #tpu.memory_space<vmem>>, vector<1x4x16x16xf32>
    %8 = vector.shape_cast %7 : vector<1x4x16x16xf32> to vector<4x16x16xf32>
    %c0_12 = arith.constant 0 : index
    %c0_13 = arith.constant 0 : index
    %c0_14 = arith.constant 0 : index
    %c0_15 = arith.constant 0 : index
    %9 = vector.load %arg8[%c0_12, %c0_13, %c0_14, %c0_15] : memref<1x4x16x16xf32, #tpu.memory_space<vmem>>, vector<1x4x16x16xf32>
    %10 = vector.shape_cast %9 : vector<1x4x16x16xf32> to vector<4x16x16xf32>
    %c0_16 = arith.constant 0 : index
    %c0_17 = arith.constant 0 : index
    %c0_18 = arith.constant 0 : index
    %c0_19 = arith.constant 0 : index
    %11 = vector.load %arg9[%c0_16, %c0_17, %c0_18, %c0_19] : memref<1x4x16x16xf32, #tpu.memory_space<vmem>>, vector<1x4x16x16xf32>
    %12 = vector.shape_cast %11 : vector<1x4x16x16xf32> to vector<4x16x16xf32>
    %c0_20 = arith.constant 0 : index
    %13 = memref.load %arg2[%c0_20] : memref<1xf32, #tpu.memory_space<smem>>
    %cst = arith.constant 1.000000e+00 : f32
    %14 = vector.broadcast %cst : f32 to vector<4x16x16xf32>
    %15 = arith.subf %14, %4 : vector<4x16x16xf32>
    %16 = vector.broadcast %13 : f32 to vector<4x16x16xf32>
    %17 = arith.mulf %16, %4 : vector<4x16x16xf32>
    %18 = arith.addf %15, %17 : vector<4x16x16xf32>
    %c0_21 = arith.constant 0 : index
    %c0_22 = arith.constant 0 : index
    %c0_23 = arith.constant 0 : index
    %19 = vector.load %arg22[%c0_21, %c0_22, %c0_23] : memref<4x16x16xf32, #tpu.memory_space<vmem>>, vector<4x16x16xf32>
    %20 = arith.mulf %18, %19 : vector<4x16x16xf32>
    %cst_24 = arith.constant 1.000000e+00 : f32
    %21 = arith.subf %cst_24, %13 : f32
    %22 = vector.broadcast %21 : f32 to vector<4x16x16xf32>
    %23 = arith.mulf %22, %6 : vector<4x16x16xf32>
    %24 = arith.addf %20, %23 : vector<4x16x16xf32>
    %c0_25 = arith.constant 0 : index
    %c0_26 = arith.constant 0 : index
    %c0_27 = arith.constant 0 : index
    %25 = vector.load %arg22[%c0_25, %c0_26, %c0_27] : memref<4x16x16xf32, #tpu.memory_space<vmem>>, vector<4x16x16xf32>
    tpu.vector_store %arg22[%c0_25, %c0_26, %c0_27], %24 {strides = array<i32>} : memref<4x16x16xf32, #tpu.memory_space<vmem>>, vector<4x16x16xf32>,
    %c0_28 = arith.constant 0 : index
    %c0_29 = arith.constant 0 : index
    %c0_30 = arith.constant 0 : index
    %26 = vector.load %arg23[%c0_28, %c0_29, %c0_30] : memref<4x16x16xf32, #tpu.memory_space<vmem>>, vector<4x16x16xf32>
    %27 = arith.mulf %18, %26 : vector<4x16x16xf32>
    %cst_31 = arith.constant 1.000000e+00 : f32
    %28 = arith.subf %cst_31, %13 : f32
    %29 = vector.broadcast %28 : f32 to vector<4x16x16xf32>
    %30 = arith.mulf %29, %8 : vector<4x16x16xf32>
    %31 = arith.addf %27, %30 : vector<4x16x16xf32>
    %c0_32 = arith.constant 0 : index
    %c0_33 = arith.constant 0 : index
    %c0_34 = arith.constant 0 : index
    %32 = vector.load %arg23[%c0_32, %c0_33, %c0_34] : memref<4x16x16xf32, #tpu.memory_space<vmem>>, vector<4x16x16xf32>
    tpu.vector_store %arg23[%c0_32, %c0_33, %c0_34], %31 {strides = array<i32>} : memref<4x16x16xf32, #tpu.memory_space<vmem>>, vector<4x16x16xf32>,
    %c0_35 = arith.constant 0 : index
    %c0_36 = arith.constant 0 : index
    %33 = vector.load %arg24[%c0_35, %c0_36] : memref<16x16xf32, #tpu.memory_space<vmem>>, vector<16x16xf32>
    %c0_37 = arith.constant 0 : index
    %c0_38 = arith.constant 0 : index
    %34 = vector.load %arg25[%c0_37, %c0_38] : memref<16x16xf32, #tpu.memory_space<vmem>>, vector<16x16xf32>
    %35 = vector.shape_cast %33 : vector<16x16xf32> to vector<1x16x16xf32>
    %36 = vector.broadcast %35 : vector<1x16x16xf32> to vector<4x16x16xf32>
    %37 = arith.mulf %10, %36 : vector<4x16x16xf32>
    %38 = vector.shape_cast %34 : vector<16x16xf32> to vector<1x16x16xf32>
    %39 = vector.broadcast %38 : vector<1x16x16xf32> to vector<4x16x16xf32>
    %40 = arith.mulf %12, %39 : vector<4x16x16xf32>
    %41 = arith.subf %37, %40 : vector<4x16x16xf32>
    %42 = vector.shape_cast %34 : vector<16x16xf32> to vector<1x16x16xf32>
    %43 = vector.broadcast %42 : vector<1x16x16xf32> to vector<4x16x16xf32>
    %44 = arith.mulf %10, %43 : vector<4x16x16xf32>
    %45 = vector.shape_cast %33 : vector<16x16xf32> to vector<1x16x16xf32>
    %46 = vector.broadcast %45 : vector<1x16x16xf32> to vector<4x16x16xf32>
    %47 = arith.mulf %12, %46 : vector<4x16x16xf32>
    %48 = arith.addf %44, %47 : vector<4x16x16xf32>
    %c0_39 = arith.constant 0 : index
    %c0_40 = arith.constant 0 : index
    %49 = vector.load %arg10[%c0_39, %c0_40] : memref<16x16xf32, #tpu.memory_space<vmem>>, vector<16x16xf32>
    %c0_41 = arith.constant 0 : index
    %c0_42 = arith.constant 0 : index
    %50 = vector.load %arg11[%c0_41, %c0_42] : memref<16x16xf32, #tpu.memory_space<vmem>>, vector<16x16xf32>
    %c0_43 = arith.constant 0 : index
    %c0_44 = arith.constant 0 : index
    %51 = vector.load %arg12[%c0_43, %c0_44] : memref<16x16xf32, #tpu.memory_space<vmem>>, vector<16x16xf32>
    %c0_45 = arith.constant 0 : index
    %c0_46 = arith.constant 0 : index
    %52 = vector.load %arg13[%c0_45, %c0_46] : memref<16x16xf32, #tpu.memory_space<vmem>>, vector<16x16xf32>
    %c0_47 = arith.constant 0 : index
    %c0_48 = arith.constant 0 : index
    %53 = vector.load %arg14[%c0_47, %c0_48] : memref<16x16xf32, #tpu.memory_space<vmem>>, vector<16x16xf32>
    %c0_49 = arith.constant 0 : index
    %c0_50 = arith.constant 0 : index
    %54 = vector.load %arg15[%c0_49, %c0_50] : memref<16x16xf32, #tpu.memory_space<vmem>>, vector<16x16xf32>
    %c0_51 = arith.constant 0 : index
    %c0_52 = arith.constant 0 : index
    %55 = vector.load %arg16[%c0_51, %c0_52] : memref<16x16xf32, #tpu.memory_space<vmem>>, vector<16x16xf32>
    %c0_53 = arith.constant 0 : index
    %c0_54 = arith.constant 0 : index
    %56 = vector.load %arg17[%c0_53, %c0_54] : memref<16x16xf32, #tpu.memory_space<vmem>>, vector<16x16xf32>
    %57 = arith.addf %49, %50 : vector<16x16xf32>
    %58 = arith.addf %51, %52 : vector<16x16xf32>
    %59 = arith.addf %53, %54 : vector<16x16xf32>
    %60 = arith.addf %55, %56 : vector<16x16xf32>
    %61 = vector.shape_cast %41 : vector<4x16x16xf32> to vector<64x16xf32>
    %62 = vector.shape_cast %48 : vector<4x16x16xf32> to vector<64x16xf32>
    %63 = arith.addf %61, %62 : vector<64x16xf32>
    %cst_55 = arith.constant dense<0.000000e+00> : vector<64x16xf32>
    %64 = tpu.matmul %61, %51, %cst_55 {dimension_numbers = #tpu.dot_dimension_numbers<[1], [0], [0], [1], [0, 0, 1, 1], [], []>} : vector<64x16xf32>, vector<16x16xf32>, vector<64x16xf32> -> vector<64x16xf32>
    %cst_56 = arith.constant dense<0.000000e+00> : vector<64x16xf32>
    %65 = tpu.matmul %62, %52, %cst_56 {dimension_numbers = #tpu.dot_dimension_numbers<[1], [0], [0], [1], [0, 0, 1, 1], [], []>} : vector<64x16xf32>, vector<16x16xf32>, vector<64x16xf32> -> vector<64x16xf32>
    %cst_57 = arith.constant dense<0.000000e+00> : vector<64x16xf32>
    %66 = tpu.matmul %63, %58, %cst_57 {dimension_numbers = #tpu.dot_dimension_numbers<[1], [0], [0], [1], [0, 0, 1, 1], [], []>} : vector<64x16xf32>, vector<16x16xf32>, vector<64x16xf32> -> vector<64x16xf32>
    %67 = arith.subf %64, %65 : vector<64x16xf32>
    %68 = arith.subf %66, %64 : vector<64x16xf32>
    %69 = arith.subf %68, %65 : vector<64x16xf32>
    %70 = vector.shape_cast %67 : vector<64x16xf32> to vector<4x16x16xf32>
    %71 = vector.shape_cast %69 : vector<64x16xf32> to vector<4x16x16xf32>
    %72 = vector.extract_strided_slice %70 {offsets = [0, 0, 0], sizes = [1, 16, 16], strides = [1, 1, 1]} : vector<4x16x16xf32> to vector<1x16x16xf32>
    %73 = vector.shape_cast %72 : vector<1x16x16xf32> to vector<16x16xf32>
    %74 = vector.extract_strided_slice %71 {offsets = [0, 0, 0], sizes = [1, 16, 16], strides = [1, 1, 1]} : vector<4x16x16xf32> to vector<1x16x16xf32>
    %75 = vector.shape_cast %74 : vector<1x16x16xf32> to vector<16x16xf32>
    %76 = arith.addf %73, %75 : vector<16x16xf32>
    %cst_58 = arith.constant dense<0.000000e+00> : vector<16x16xf32>
    %77 = tpu.matmul %49, %73, %cst_58 {dimension_numbers = #tpu.dot_dimension_numbers<[1], [0], [0], [1], [0, 0, 1, 1], [], []>} : vector<16x16xf32>, vector<16x16xf32>, vector<16x16xf32> -> vector<16x16xf32>
    %cst_59 = arith.constant dense<0.000000e+00> : vector<16x16xf32>
    %78 = tpu.matmul %50, %75, %cst_59 {dimension_numbers = #tpu.dot_dimension_numbers<[1], [0], [0], [1], [0, 0, 1, 1], [], []>} : vector<16x16xf32>, vector<16x16xf32>, vector<16x16xf32> -> vector<16x16xf32>
    %cst_60 = arith.constant dense<0.000000e+00> : vector<16x16xf32>
    %79 = tpu.matmul %57, %76, %cst_60 {dimension_numbers = #tpu.dot_dimension_numbers<[1], [0], [0], [1], [0, 0, 1, 1], [], []>} : vector<16x16xf32>, vector<16x16xf32>, vector<16x16xf32> -> vector<16x16xf32>
    %80 = arith.subf %77, %78 : vector<16x16xf32>
    %81 = arith.subf %79, %77 : vector<16x16xf32>
    %82 = arith.subf %81, %78 : vector<16x16xf32>
    %83 = vector.extract_strided_slice %4 {offsets = [0, 0, 0], sizes = [1, 16, 16], strides = [1, 1, 1]} : vector<4x16x16xf32> to vector<1x16x16xf32>
    %84 = vector.shape_cast %83 : vector<1x16x16xf32> to vector<16x16xf32>
    %85 = vector.extract_strided_slice %6 {offsets = [0, 0, 0], sizes = [1, 16, 16], strides = [1, 1, 1]} : vector<4x16x16xf32> to vector<1x16x16xf32>
    %86 = vector.shape_cast %85 : vector<1x16x16xf32> to vector<16x16xf32>
    %87 = arith.mulf %84, %80 : vector<16x16xf32>
    %88 = arith.subf %86, %87 : vector<16x16xf32>
    %89 = arith.mulf %84, %88 : vector<16x16xf32>
    %90 = vector.extract_strided_slice %8 {offsets = [0, 0, 0], sizes = [1, 16, 16], strides = [1, 1, 1]} : vector<4x16x16xf32> to vector<1x16x16xf32>
    %91 = vector.shape_cast %90 : vector<1x16x16xf32> to vector<16x16xf32>
    %92 = arith.mulf %84, %82 : vector<16x16xf32>
    %93 = arith.subf %91, %92 : vector<16x16xf32>
    %94 = arith.mulf %84, %93 : vector<16x16xf32>
    %95 = arith.addf %89, %94 : vector<16x16xf32>
    %cst_61 = arith.constant dense<0.000000e+00> : vector<16x16xf32>
    %96 = tpu.matmul %53, %89, %cst_61 {dimension_numbers = #tpu.dot_dimension_numbers<[1], [0], [0], [1], [0, 0, 1, 1], [], []>} : vector<16x16xf32>, vector<16x16xf32>, vector<16x16xf32> -> vector<16x16xf32>
    %cst_62 = arith.constant dense<0.000000e+00> : vector<16x16xf32>
    %97 = tpu.matmul %54, %94, %cst_62 {dimension_numbers = #tpu.dot_dimension_numbers<[1], [0], [0], [1], [0, 0, 1, 1], [], []>} : vector<16x16xf32>, vector<16x16xf32>, vector<16x16xf32> -> vector<16x16xf32>
    %cst_63 = arith.constant dense<0.000000e+00> : vector<16x16xf32>
    %98 = tpu.matmul %59, %95, %cst_63 {dimension_numbers = #tpu.dot_dimension_numbers<[1], [0], [0], [1], [0, 0, 1, 1], [], []>} : vector<16x16xf32>, vector<16x16xf32>, vector<16x16xf32> -> vector<16x16xf32>
    %99 = arith.subf %96, %97 : vector<16x16xf32>
    %100 = arith.subf %98, %96 : vector<16x16xf32>
    %101 = arith.subf %100, %97 : vector<16x16xf32>
    %102 = vector.extract_strided_slice %70 {offsets = [1, 0, 0], sizes = [1, 16, 16], strides = [1, 1, 1]} : vector<4x16x16xf32> to vector<1x16x16xf32>
    %103 = vector.shape_cast %102 : vector<1x16x16xf32> to vector<16x16xf32>
    %104 = vector.extract_strided_slice %71 {offsets = [1, 0, 0], sizes = [1, 16, 16], strides = [1, 1, 1]} : vector<4x16x16xf32> to vector<1x16x16xf32>
    %105 = vector.shape_cast %104 : vector<1x16x16xf32> to vector<16x16xf32>
    %106 = arith.addf %103, %105 : vector<16x16xf32>
    %cst_64 = arith.constant dense<0.000000e+00> : vector<16x16xf32>
    %107 = tpu.matmul %49, %103, %cst_64 {dimension_numbers = #tpu.dot_dimension_numbers<[1], [0], [0], [1], [0, 0, 1, 1], [], []>} : vector<16x16xf32>, vector<16x16xf32>, vector<16x16xf32> -> vector<16x16xf32>
    %cst_65 = arith.constant dense<0.000000e+00> : vector<16x16xf32>
    %108 = tpu.matmul %50, %105, %cst_65 {dimension_numbers = #tpu.dot_dimension_numbers<[1], [0], [0], [1], [0, 0, 1, 1], [], []>} : vector<16x16xf32>, vector<16x16xf32>, vector<16x16xf32> -> vector<16x16xf32>
    %cst_66 = arith.constant dense<0.000000e+00> : vector<16x16xf32>
    %109 = tpu.matmul %57, %106, %cst_66 {dimension_numbers = #tpu.dot_dimension_numbers<[1], [0], [0], [1], [0, 0, 1, 1], [], []>} : vector<16x16xf32>, vector<16x16xf32>, vector<16x16xf32> -> vector<16x16xf32>
    %110 = arith.subf %107, %108 : vector<16x16xf32>
    %111 = arith.subf %109, %107 : vector<16x16xf32>
    %112 = arith.subf %111, %108 : vector<16x16xf32>
    %113 = vector.extract_strided_slice %4 {offsets = [1, 0, 0], sizes = [1, 16, 16], strides = [1, 1, 1]} : vector<4x16x16xf32> to vector<1x16x16xf32>
    %114 = vector.shape_cast %113 : vector<1x16x16xf32> to vector<16x16xf32>
    %115 = vector.extract_strided_slice %6 {offsets = [1, 0, 0], sizes = [1, 16, 16], strides = [1, 1, 1]} : vector<4x16x16xf32> to vector<1x16x16xf32>
    %116 = vector.shape_cast %115 : vector<1x16x16xf32> to vector<16x16xf32>
    %117 = arith.mulf %114, %110 : vector<16x16xf32>
    %118 = arith.subf %116, %117 : vector<16x16xf32>
    %119 = arith.mulf %114, %118 : vector<16x16xf32>
    %120 = vector.extract_strided_slice %8 {offsets = [1, 0, 0], sizes = [1, 16, 16], strides = [1, 1, 1]} : vector<4x16x16xf32> to vector<1x16x16xf32>
    %121 = vector.shape_cast %120 : vector<1x16x16xf32> to vector<16x16xf32>
    %122 = arith.mulf %114, %112 : vector<16x16xf32>
    %123 = arith.subf %121, %122 : vector<16x16xf32>
    %124 = arith.mulf %114, %123 : vector<16x16xf32>
    %125 = arith.addf %119, %124 : vector<16x16xf32>
    %cst_67 = arith.constant dense<0.000000e+00> : vector<16x16xf32>
    %126 = tpu.matmul %53, %119, %cst_67 {dimension_numbers = #tpu.dot_dimension_numbers<[1], [0], [0], [1], [0, 0, 1, 1], [], []>} : vector<16x16xf32>, vector<16x16xf32>, vector<16x16xf32> -> vector<16x16xf32>
    %cst_68 = arith.constant dense<0.000000e+00> : vector<16x16xf32>
    %127 = tpu.matmul %54, %124, %cst_68 {dimension_numbers = #tpu.dot_dimension_numbers<[1], [0], [0], [1], [0, 0, 1, 1], [], []>} : vector<16x16xf32>, vector<16x16xf32>, vector<16x16xf32> -> vector<16x16xf32>
    %cst_69 = arith.constant dense<0.000000e+00> : vector<16x16xf32>
    %128 = tpu.matmul %59, %125, %cst_69 {dimension_numbers = #tpu.dot_dimension_numbers<[1], [0], [0], [1], [0, 0, 1, 1], [], []>} : vector<16x16xf32>, vector<16x16xf32>, vector<16x16xf32> -> vector<16x16xf32>
    %129 = arith.subf %126, %127 : vector<16x16xf32>
    %130 = arith.subf %128, %126 : vector<16x16xf32>
    %131 = arith.subf %130, %127 : vector<16x16xf32>
    %132 = vector.extract_strided_slice %70 {offsets = [2, 0, 0], sizes = [1, 16, 16], strides = [1, 1, 1]} : vector<4x16x16xf32> to vector<1x16x16xf32>
    %133 = vector.shape_cast %132 : vector<1x16x16xf32> to vector<16x16xf32>
    %134 = vector.extract_strided_slice %71 {offsets = [2, 0, 0], sizes = [1, 16, 16], strides = [1, 1, 1]} : vector<4x16x16xf32> to vector<1x16x16xf32>
    %135 = vector.shape_cast %134 : vector<1x16x16xf32> to vector<16x16xf32>
    %136 = arith.addf %133, %135 : vector<16x16xf32>
    %cst_70 = arith.constant dense<0.000000e+00> : vector<16x16xf32>
    %137 = tpu.matmul %49, %133, %cst_70 {dimension_numbers = #tpu.dot_dimension_numbers<[1], [0], [0], [1], [0, 0, 1, 1], [], []>} : vector<16x16xf32>, vector<16x16xf32>, vector<16x16xf32> -> vector<16x16xf32>
    %cst_71 = arith.constant dense<0.000000e+00> : vector<16x16xf32>
    %138 = tpu.matmul %50, %135, %cst_71 {dimension_numbers = #tpu.dot_dimension_numbers<[1], [0], [0], [1], [0, 0, 1, 1], [], []>} : vector<16x16xf32>, vector<16x16xf32>, vector<16x16xf32> -> vector<16x16xf32>
    %cst_72 = arith.constant dense<0.000000e+00> : vector<16x16xf32>
    %139 = tpu.matmul %57, %136, %cst_72 {dimension_numbers = #tpu.dot_dimension_numbers<[1], [0], [0], [1], [0, 0, 1, 1], [], []>} : vector<16x16xf32>, vector<16x16xf32>, vector<16x16xf32> -> vector<16x16xf32>
    %140 = arith.subf %137, %138 : vector<16x16xf32>
    %141 = arith.subf %139, %137 : vector<16x16xf32>
    %142 = arith.subf %141, %138 : vector<16x16xf32>
    %143 = vector.extract_strided_slice %4 {offsets = [2, 0, 0], sizes = [1, 16, 16], strides = [1, 1, 1]} : vector<4x16x16xf32> to vector<1x16x16xf32>
    %144 = vector.shape_cast %143 : vector<1x16x16xf32> to vector<16x16xf32>
    %145 = vector.extract_strided_slice %6 {offsets = [2, 0, 0], sizes = [1, 16, 16], strides = [1, 1, 1]} : vector<4x16x16xf32> to vector<1x16x16xf32>
    %146 = vector.shape_cast %145 : vector<1x16x16xf32> to vector<16x16xf32>
    %147 = arith.mulf %144, %140 : vector<16x16xf32>
    %148 = arith.subf %146, %147 : vector<16x16xf32>
    %149 = arith.mulf %144, %148 : vector<16x16xf32>
    %150 = vector.extract_strided_slice %8 {offsets = [2, 0, 0], sizes = [1, 16, 16], strides = [1, 1, 1]} : vector<4x16x16xf32> to vector<1x16x16xf32>
    %151 = vector.shape_cast %150 : vector<1x16x16xf32> to vector<16x16xf32>
    %152 = arith.mulf %144, %142 : vector<16x16xf32>
    %153 = arith.subf %151, %152 : vector<16x16xf32>
    %154 = arith.mulf %144, %153 : vector<16x16xf32>
    %155 = arith.addf %149, %154 : vector<16x16xf32>
    %cst_73 = arith.constant dense<0.000000e+00> : vector<16x16xf32>
    %156 = tpu.matmul %53, %149, %cst_73 {dimension_numbers = #tpu.dot_dimension_numbers<[1], [0], [0], [1], [0, 0, 1, 1], [], []>} : vector<16x16xf32>, vector<16x16xf32>, vector<16x16xf32> -> vector<16x16xf32>
    %cst_74 = arith.constant dense<0.000000e+00> : vector<16x16xf32>
    %157 = tpu.matmul %54, %154, %cst_74 {dimension_numbers = #tpu.dot_dimension_numbers<[1], [0], [0], [1], [0, 0, 1, 1], [], []>} : vector<16x16xf32>, vector<16x16xf32>, vector<16x16xf32> -> vector<16x16xf32>
    %cst_75 = arith.constant dense<0.000000e+00> : vector<16x16xf32>
    %158 = tpu.matmul %59, %155, %cst_75 {dimension_numbers = #tpu.dot_dimension_numbers<[1], [0], [0], [1], [0, 0, 1, 1], [], []>} : vector<16x16xf32>, vector<16x16xf32>, vector<16x16xf32> -> vector<16x16xf32>
    %159 = arith.subf %156, %157 : vector<16x16xf32>
    %160 = arith.subf %158, %156 : vector<16x16xf32>
    %161 = arith.subf %160, %157 : vector<16x16xf32>
    %162 = vector.extract_strided_slice %70 {offsets = [3, 0, 0], sizes = [1, 16, 16], strides = [1, 1, 1]} : vector<4x16x16xf32> to vector<1x16x16xf32>
    %163 = vector.shape_cast %162 : vector<1x16x16xf32> to vector<16x16xf32>
    %164 = vector.extract_strided_slice %71 {offsets = [3, 0, 0], sizes = [1, 16, 16], strides = [1, 1, 1]} : vector<4x16x16xf32> to vector<1x16x16xf32>
    %165 = vector.shape_cast %164 : vector<1x16x16xf32> to vector<16x16xf32>
    %166 = arith.addf %163, %165 : vector<16x16xf32>
    %cst_76 = arith.constant dense<0.000000e+00> : vector<16x16xf32>
    %167 = tpu.matmul %49, %163, %cst_76 {dimension_numbers = #tpu.dot_dimension_numbers<[1], [0], [0], [1], [0, 0, 1, 1], [], []>} : vector<16x16xf32>, vector<16x16xf32>, vector<16x16xf32> -> vector<16x16xf32>
    %cst_77 = arith.constant dense<0.000000e+00> : vector<16x16xf32>
    %168 = tpu.matmul %50, %165, %cst_77 {dimension_numbers = #tpu.dot_dimension_numbers<[1], [0], [0], [1], [0, 0, 1, 1], [], []>} : vector<16x16xf32>, vector<16x16xf32>, vector<16x16xf32> -> vector<16x16xf32>
    %cst_78 = arith.constant dense<0.000000e+00> : vector<16x16xf32>
    %169 = tpu.matmul %57, %166, %cst_78 {dimension_numbers = #tpu.dot_dimension_numbers<[1], [0], [0], [1], [0, 0, 1, 1], [], []>} : vector<16x16xf32>, vector<16x16xf32>, vector<16x16xf32> -> vector<16x16xf32>
    %170 = arith.subf %167, %168 : vector<16x16xf32>
    %171 = arith.subf %169, %167 : vector<16x16xf32>
    %172 = arith.subf %171, %168 : vector<16x16xf32>
    %173 = vector.extract_strided_slice %4 {offsets = [3, 0, 0], sizes = [1, 16, 16], strides = [1, 1, 1]} : vector<4x16x16xf32> to vector<1x16x16xf32>
    %174 = vector.shape_cast %173 : vector<1x16x16xf32> to vector<16x16xf32>
    %175 = vector.extract_strided_slice %6 {offsets = [3, 0, 0], sizes = [1, 16, 16], strides = [1, 1, 1]} : vector<4x16x16xf32> to vector<1x16x16xf32>
    %176 = vector.shape_cast %175 : vector<1x16x16xf32> to vector<16x16xf32>
    %177 = arith.mulf %174, %170 : vector<16x16xf32>
    %178 = arith.subf %176, %177 : vector<16x16xf32>
    %179 = arith.mulf %174, %178 : vector<16x16xf32>
    %180 = vector.extract_strided_slice %8 {offsets = [3, 0, 0], sizes = [1, 16, 16], strides = [1, 1, 1]} : vector<4x16x16xf32> to vector<1x16x16xf32>
    %181 = vector.shape_cast %180 : vector<1x16x16xf32> to vector<16x16xf32>
    %182 = arith.mulf %174, %172 : vector<16x16xf32>
    %183 = arith.subf %181, %182 : vector<16x16xf32>
    %184 = arith.mulf %174, %183 : vector<16x16xf32>
    %185 = arith.addf %179, %184 : vector<16x16xf32>
    %cst_79 = arith.constant dense<0.000000e+00> : vector<16x16xf32>
    %186 = tpu.matmul %53, %179, %cst_79 {dimension_numbers = #tpu.dot_dimension_numbers<[1], [0], [0], [1], [0, 0, 1, 1], [], []>} : vector<16x16xf32>, vector<16x16xf32>, vector<16x16xf32> -> vector<16x16xf32>
    %cst_80 = arith.constant dense<0.000000e+00> : vector<16x16xf32>
    %187 = tpu.matmul %54, %184, %cst_80 {dimension_numbers = #tpu.dot_dimension_numbers<[1], [0], [0], [1], [0, 0, 1, 1], [], []>} : vector<16x16xf32>, vector<16x16xf32>, vector<16x16xf32> -> vector<16x16xf32>
    %cst_81 = arith.constant dense<0.000000e+00> : vector<16x16xf32>
    %188 = tpu.matmul %59, %185, %cst_81 {dimension_numbers = #tpu.dot_dimension_numbers<[1], [0], [0], [1], [0, 0, 1, 1], [], []>} : vector<16x16xf32>, vector<16x16xf32>, vector<16x16xf32> -> vector<16x16xf32>
    %189 = arith.subf %186, %187 : vector<16x16xf32>
    %190 = arith.subf %188, %186 : vector<16x16xf32>
    %191 = arith.subf %190, %187 : vector<16x16xf32>
    %192 = vector.shape_cast %99 : vector<16x16xf32> to vector<1x16x16xf32>
    %193 = vector.shape_cast %129 : vector<16x16xf32> to vector<1x16x16xf32>
    %194 = vector.shape_cast %159 : vector<16x16xf32> to vector<1x16x16xf32>
    %195 = vector.shape_cast %189 : vector<16x16xf32> to vector<1x16x16xf32>
    %196 = tpu.concatenate %192, %193, %194, %195 in 0 : vector<1x16x16xf32>, vector<1x16x16xf32>, vector<1x16x16xf32>, vector<1x16x16xf32> -> vector<4x16x16xf32>
    %197 = vector.shape_cast %101 : vector<16x16xf32> to vector<1x16x16xf32>
    %198 = vector.shape_cast %131 : vector<16x16xf32> to vector<1x16x16xf32>
    %199 = vector.shape_cast %161 : vector<16x16xf32> to vector<1x16x16xf32>
    %200 = vector.shape_cast %191 : vector<16x16xf32> to vector<1x16x16xf32>
    %201 = tpu.concatenate %197, %198, %199, %200 in 0 : vector<1x16x16xf32>, vector<1x16x16xf32>, vector<1x16x16xf32>, vector<1x16x16xf32> -> vector<4x16x16xf32>
    %202 = vector.shape_cast %196 : vector<4x16x16xf32> to vector<64x16xf32>
    %203 = vector.shape_cast %201 : vector<4x16x16xf32> to vector<64x16xf32>
    %204 = arith.addf %202, %203 : vector<64x16xf32>
    %cst_82 = arith.constant dense<0.000000e+00> : vector<64x16xf32>
    %205 = tpu.matmul %202, %55, %cst_82 {dimension_numbers = #tpu.dot_dimension_numbers<[1], [0], [0], [1], [0, 0, 1, 1], [], []>} : vector<64x16xf32>, vector<16x16xf32>, vector<64x16xf32> -> vector<64x16xf32>
    %cst_83 = arith.constant dense<0.000000e+00> : vector<64x16xf32>
    %206 = tpu.matmul %203, %56, %cst_83 {dimension_numbers = #tpu.dot_dimension_numbers<[1], [0], [0], [1], [0, 0, 1, 1], [], []>} : vector<64x16xf32>, vector<16x16xf32>, vector<64x16xf32> -> vector<64x16xf32>
    %cst_84 = arith.constant dense<0.000000e+00> : vector<64x16xf32>
    %207 = tpu.matmul %204, %60, %cst_84 {dimension_numbers = #tpu.dot_dimension_numbers<[1], [0], [0], [1], [0, 0, 1, 1], [], []>} : vector<64x16xf32>, vector<16x16xf32>, vector<64x16xf32> -> vector<64x16xf32>
    %208 = arith.subf %205, %206 : vector<64x16xf32>
    %209 = arith.subf %207, %205 : vector<64x16xf32>
    %210 = arith.subf %209, %206 : vector<64x16xf32>
    %211 = vector.shape_cast %208 : vector<64x16xf32> to vector<4x16x16xf32>
    %212 = vector.shape_cast %210 : vector<64x16xf32> to vector<4x16x16xf32>
    %213 = arith.mulf %10, %211 : vector<4x16x16xf32>
    %214 = arith.mulf %12, %212 : vector<4x16x16xf32>
    %215 = arith.addf %213, %214 : vector<4x16x16xf32>
    %cst_85 = arith.constant dense<0.000000e+00> : vector<16x16xf32>
    %216 = vector.multi_reduction <add>, %215, %cst_85 [0] : vector<4x16x16xf32> to vector<16x16xf32>
    %217 = arith.addf %33, %216 : vector<16x16xf32>
    %c0_86 = arith.constant 0 : index
    %c0_87 = arith.constant 0 : index
    %218 = vector.load %arg24[%c0_86, %c0_87] : memref<16x16xf32, #tpu.memory_space<vmem>>, vector<16x16xf32>
    tpu.vector_store %arg24[%c0_86, %c0_87], %217 {strides = array<i32>} : memref<16x16xf32, #tpu.memory_space<vmem>>, vector<16x16xf32>,
    %219 = arith.mulf %10, %212 : vector<4x16x16xf32>
    %220 = arith.mulf %12, %211 : vector<4x16x16xf32>
    %221 = arith.subf %219, %220 : vector<4x16x16xf32>
    %cst_88 = arith.constant dense<0.000000e+00> : vector<16x16xf32>
    %222 = vector.multi_reduction <add>, %221, %cst_88 [0] : vector<4x16x16xf32> to vector<16x16xf32>
    %223 = arith.addf %34, %222 : vector<16x16xf32>
    %c0_89 = arith.constant 0 : index
    %c0_90 = arith.constant 0 : index
    %224 = vector.load %arg25[%c0_89, %c0_90] : memref<16x16xf32, #tpu.memory_space<vmem>>, vector<16x16xf32>
    tpu.vector_store %arg25[%c0_89, %c0_90], %223 {strides = array<i32>} : memref<16x16xf32, #tpu.memory_space<vmem>>, vector<16x16xf32>,
    %c7_i32 = arith.constant 7 : i32
    %225 = arith.cmpi eq, %arg1, %c7_i32 : i32
    %226 = arith.extui %225 : i1 to i32
    %c0_i32_91 = arith.constant 0 : i32
    %227 = arith.cmpi ne, %226, %c0_i32_91 : i32
    scf.if %227 {
      %c0_92 = arith.constant 0 : index
      %c0_93 = arith.constant 0 : index
      %c0_94 = arith.constant 0 : index
      %228 = vector.load %arg22[%c0_92, %c0_93, %c0_94] : memref<4x16x16xf32, #tpu.memory_space<vmem>>, vector<4x16x16xf32>
      %c0_95 = arith.constant 0 : index
      %c0_96 = arith.constant 0 : index
      %c0_97 = arith.constant 0 : index
      %c0_98 = arith.constant 0 : index
      %229 = vector.load %arg18[%c0_95, %c0_96, %c0_97, %c0_98] : memref<1x4x16x16xf32, #tpu.memory_space<vmem>>, vector<1x4x16x16xf32>
      %230 = vector.shape_cast %229 : vector<1x4x16x16xf32> to vector<4x16x16xf32>
      %231 = vector.shape_cast %228 : vector<4x16x16xf32> to vector<1x4x16x16xf32>
      tpu.vector_store %arg18[%c0_95, %c0_96, %c0_97, %c0_98], %231 {strides = array<i32>} : memref<1x4x16x16xf32, #tpu.memory_space<vmem>>, vector<1x4x16x16xf32>,
      %c0_99 = arith.constant 0 : index
      %c0_100 = arith.constant 0 : index
      %c0_101 = arith.constant 0 : index
      %232 = vector.load %arg23[%c0_99, %c0_100, %c0_101] : memref<4x16x16xf32, #tpu.memory_space<vmem>>, vector<4x16x16xf32>
      %c0_102 = arith.constant 0 : index
      %c0_103 = arith.constant 0 : index
      %c0_104 = arith.constant 0 : index
      %c0_105 = arith.constant 0 : index
      %233 = vector.load %arg19[%c0_102, %c0_103, %c0_104, %c0_105] : memref<1x4x16x16xf32, #tpu.memory_space<vmem>>, vector<1x4x16x16xf32>
      %234 = vector.shape_cast %233 : vector<1x4x16x16xf32> to vector<4x16x16xf32>
      %235 = vector.shape_cast %232 : vector<4x16x16xf32> to vector<1x4x16x16xf32>
      tpu.vector_store %arg19[%c0_102, %c0_103, %c0_104, %c0_105], %235 {strides = array<i32>} : memref<1x4x16x16xf32, #tpu.memory_space<vmem>>, vector<1x4x16x16xf32>,
      %c0_106 = arith.constant 0 : index
      %c0_107 = arith.constant 0 : index
      %236 = vector.load %arg24[%c0_106, %c0_107] : memref<16x16xf32, #tpu.memory_space<vmem>>, vector<16x16xf32>
      %c0_108 = arith.constant 0 : index
      %c0_109 = arith.constant 0 : index
      %c0_110 = arith.constant 0 : index
      %237 = vector.load %arg20[%c0_108, %c0_109, %c0_110] : memref<1x16x16xf32, #tpu.memory_space<vmem>>, vector<1x16x16xf32>
      %238 = vector.shape_cast %237 : vector<1x16x16xf32> to vector<16x16xf32>
      %239 = vector.shape_cast %236 : vector<16x16xf32> to vector<1x16x16xf32>
      tpu.vector_store %arg20[%c0_108, %c0_109, %c0_110], %239 {strides = array<i32>} : memref<1x16x16xf32, #tpu.memory_space<vmem>>, vector<1x16x16xf32>,
      %c0_111 = arith.constant 0 : index
      %c0_112 = arith.constant 0 : index
      %240 = vector.load %arg25[%c0_111, %c0_112] : memref<16x16xf32, #tpu.memory_space<vmem>>, vector<16x16xf32>
      %c0_113 = arith.constant 0 : index
      %c0_114 = arith.constant 0 : index
      %c0_115 = arith.constant 0 : index
      %241 = vector.load %arg21[%c0_113, %c0_114, %c0_115] : memref<1x16x16xf32, #tpu.memory_space<vmem>>, vector<1x16x16xf32>
      %242 = vector.shape_cast %241 : vector<1x16x16xf32> to vector<16x16xf32>
      %243 = vector.shape_cast %240 : vector<16x16xf32> to vector<1x16x16xf32>
      tpu.vector_store %arg21[%c0_113, %c0_114, %c0_115], %243 {strides = array<i32>} : memref<1x16x16xf32, #tpu.memory_space<vmem>>, vector<1x16x16xf32>,
    } else {
    }
    return
  }
  func.func @transform_0(%arg0: i32, %arg1: i32, %arg2: memref<1xf32, #tpu.memory_space<smem>>) -> (i32, i32, i32) {
    %c0_i32 = arith.constant 0 : i32
    %c0_i32_0 = arith.constant 0 : i32
    %c0_i32_1 = arith.constant 0 : i32
    return %arg0, %c0_i32, %c0_i32_0 : i32, i32, i32
  }
  func.func @transform_1(%arg0: i32, %arg1: i32, %arg2: memref<1xf32, #tpu.memory_space<smem>>) -> (i32, i32, i32) {
    %c0_i32 = arith.constant 0 : i32
    %c0_i32_0 = arith.constant 0 : i32
    %c0_i32_1 = arith.constant 0 : i32
    return %arg0, %c0_i32, %c0_i32_0 : i32, i32, i32
  }
  func.func @transform_2(%arg0: i32, %arg1: i32, %arg2: memref<1xf32, #tpu.memory_space<smem>>) -> (i32, i32, i32, i32) {
    %c0_i32 = arith.constant 0 : i32
    %c0_i32_0 = arith.constant 0 : i32
    %c0_i32_1 = arith.constant 0 : i32
    %c0_i32_2 = arith.constant 0 : i32
    return %arg0, %c0_i32, %c0_i32_0, %c0_i32_1 : i32, i32, i32, i32
  }
  func.func @transform_3(%arg0: i32, %arg1: i32, %arg2: memref<1xf32, #tpu.memory_space<smem>>) -> (i32, i32, i32, i32) {
    %c0_i32 = arith.constant 0 : i32
    %c0_i32_0 = arith.constant 0 : i32
    %c0_i32_1 = arith.constant 0 : i32
    %c0_i32_2 = arith.constant 0 : i32
    return %arg0, %c0_i32, %c0_i32_0, %c0_i32_1 : i32, i32, i32, i32
  }
  func.func @transform_4(%arg0: i32, %arg1: i32, %arg2: memref<1xf32, #tpu.memory_space<smem>>) -> (i32, i32, i32, i32) {
    %c0_i32 = arith.constant 0 : i32
    %c0_i32_0 = arith.constant 0 : i32
    %c0_i32_1 = arith.constant 0 : i32
    %c0_i32_2 = arith.constant 0 : i32
    return %arg0, %c0_i32, %c0_i32_0, %c0_i32_1 : i32, i32, i32, i32
  }
  func.func @transform_5(%arg0: i32, %arg1: i32, %arg2: memref<1xf32, #tpu.memory_space<smem>>) -> (i32, i32, i32, i32) {
    %c0_i32 = arith.constant 0 : i32
    %c0_i32_0 = arith.constant 0 : i32
    %c0_i32_1 = arith.constant 0 : i32
    %c0_i32_2 = arith.constant 0 : i32
    return %arg0, %c0_i32, %c0_i32_0, %c0_i32_1 : i32, i32, i32, i32
  }
  func.func @transform_6(%arg0: i32, %arg1: i32, %arg2: memref<1xf32, #tpu.memory_space<smem>>) -> (i32, i32, i32, i32) {
    %c0_i32 = arith.constant 0 : i32
    %c0_i32_0 = arith.constant 0 : i32
    %c0_i32_1 = arith.constant 0 : i32
    %c0_i32_2 = arith.constant 0 : i32
    return %arg0, %c0_i32, %c0_i32_0, %c0_i32_1 : i32, i32, i32, i32
  }
  func.func @transform_7(%arg0: i32, %arg1: i32, %arg2: memref<1xf32, #tpu.memory_space<smem>>) -> (i32, i32) {
    %c0_i32 = arith.constant 0 : i32
    %c0_i32_0 = arith.constant 0 : i32
    %c0_i32_1 = arith.constant 0 : i32
    return %c0_i32, %c0_i32_0 : i32, i32
  }
  func.func @transform_8(%arg0: i32, %arg1: i32, %arg2: memref<1xf32, #tpu.memory_space<smem>>) -> (i32, i32) {
    %c0_i32 = arith.constant 0 : i32
    %c0_i32_0 = arith.constant 0 : i32
    %c0_i32_1 = arith.constant 0 : i32
    return %c0_i32, %c0_i32_0 : i32, i32
  }
  func.func @transform_9(%arg0: i32, %arg1: i32, %arg2: memref<1xf32, #tpu.memory_space<smem>>) -> (i32, i32) {
    %c0_i32 = arith.constant 0 : i32
    %c0_i32_0 = arith.constant 0 : i32
    %c0_i32_1 = arith.constant 0 : i32
    return %c0_i32, %c0_i32_0 : i32, i32
  }
  func.func @transform_10(%arg0: i32, %arg1: i32, %arg2: memref<1xf32, #tpu.memory_space<smem>>) -> (i32, i32) {
    %c0_i32 = arith.constant 0 : i32
    %c0_i32_0 = arith.constant 0 : i32
    %c0_i32_1 = arith.constant 0 : i32
    return %c0_i32, %c0_i32_0 : i32, i32
  }
  func.func @transform_11(%arg0: i32, %arg1: i32, %arg2: memref<1xf32, #tpu.memory_space<smem>>) -> (i32, i32) {
    %c0_i32 = arith.constant 0 : i32
    %c0_i32_0 = arith.constant 0 : i32
    %c0_i32_1 = arith.constant 0 : i32
    return %c0_i32, %c0_i32_0 : i32, i32
  }
  func.func @transform_12(%arg0: i32, %arg1: i32, %arg2: memref<1xf32, #tpu.memory_space<smem>>) -> (i32, i32) {
    %c0_i32 = arith.constant 0 : i32
    %c0_i32_0 = arith.constant 0 : i32
    %c0_i32_1 = arith.constant 0 : i32
    return %c0_i32, %c0_i32_0 : i32, i32
  }
  func.func @transform_13(%arg0: i32, %arg1: i32, %arg2: memref<1xf32, #tpu.memory_space<smem>>) -> (i32, i32) {
    %c0_i32 = arith.constant 0 : i32
    %c0_i32_0 = arith.constant 0 : i32
    %c0_i32_1 = arith.constant 0 : i32
    return %c0_i32, %c0_i32_0 : i32, i32
  }
  func.func @transform_14(%arg0: i32, %arg1: i32, %arg2: memref<1xf32, #tpu.memory_space<smem>>) -> (i32, i32) {
    %c0_i32 = arith.constant 0 : i32
    %c0_i32_0 = arith.constant 0 : i32
    %c0_i32_1 = arith.constant 0 : i32
    return %c0_i32, %c0_i32_0 : i32, i32
  }
  func.func @transform_15(%arg0: i32, %arg1: i32, %arg2: memref<1xf32, #tpu.memory_space<smem>>) -> (i32, i32, i32, i32) {
    %c0_i32 = arith.constant 0 : i32
    %c0_i32_0 = arith.constant 0 : i32
    %c0_i32_1 = arith.constant 0 : i32
    %c0_i32_2 = arith.constant 0 : i32
    return %arg0, %c0_i32, %c0_i32_0, %c0_i32_1 : i32, i32, i32, i32
  }
  func.func @transform_16(%arg0: i32, %arg1: i32, %arg2: memref<1xf32, #tpu.memory_space<smem>>) -> (i32, i32, i32, i32) {
    %c0_i32 = arith.constant 0 : i32
    %c0_i32_0 = arith.constant 0 : i32
    %c0_i32_1 = arith.constant 0 : i32
    %c0_i32_2 = arith.constant 0 : i32
    return %arg0, %c0_i32, %c0_i32_0, %c0_i32_1 : i32, i32, i32, i32
  }
  func.func @transform_17(%arg0: i32, %arg1: i32, %arg2: memref<1xf32, #tpu.memory_space<smem>>) -> (i32, i32, i32) {
    %c0_i32 = arith.constant 0 : i32
    %c0_i32_0 = arith.constant 0 : i32
    %c0_i32_1 = arith.constant 0 : i32
    return %arg0, %c0_i32, %c0_i32_0 : i32, i32, i32
  }
  func.func @transform_18(%arg0: i32, %arg1: i32, %arg2: memref<1xf32, #tpu.memory_space<smem>>) -> (i32, i32, i32) {
    %c0_i32 = arith.constant 0 : i32
    %c0_i32_0 = arith.constant 0 : i32
    %c0_i32_1 = arith.constant 0 : i32
    return %arg0, %c0_i32, %c0_i32_0 : i32, i32, i32
  }
}

</mosaic_0001>

<bundles_post_ra>
// kernel: a_liknet_forward.1
= control target key start
LH: loop header
LB: loop body
LE: loop exit
PB: predicated region body
PF: predicated region fallthrough
CT: control target
= control target key end

     0   :  { %s6097_s0 = inlined_call_operand.<no memory space> [shape: f32[1], index: 0, kind: input, shape index: {}]   ;;  %s6098_s1 = inlined_call_operand.vmem [shape: f32[2,16,16], index: 1, kind: input, shape index: {}]   ;;  %s6099_s2 = inlined_call_operand.vmem [shape: f32[2,16,16], index: 2, kind: input, shape index: {}]   ;;  %s6100_s3 = inlined_call_operand.vmem [shape: f32[2,4,16,16], index: 3, kind: input, shape index: {}]   ;;  %s6101_s4 = inlined_call_operand.vmem [shape: f32[2,4,16,16], index: 4, kind: input, shape index: {}]   ;;  %s6102_s5 = inlined_call_operand.vmem [shape: f32[2,4,16,16], index: 5, kind: input, shape index: {}]   ;;  %s6103_s6 = inlined_call_operand.vmem [shape: f32[2,4,16,16], index: 6, kind: input, shape index: {}]   ;;  %s6104_s7 = inlined_call_operand.vmem [shape: f32[2,4,16,16], index: 7, kind: input, shape index: {}]   ;;  %s6105_s8 = inlined_call_operand.vmem [shape: f32[16,16], index: 8, kind: input, shape index: {}, may-alias: {8,14}]   ;;  %s6106_s9 = inlined_call_operand.vmem [shape: f32[16,16], index: 9, kind: input, shape index: {}]   ;;  %s6107_s10 = inlined_call_operand.vmem [shape: f32[16,16], index: 10, kind: input, shape index: {}, may-alias: {10,12}]   ;;  %s6108_s11 = inlined_call_operand.vmem [shape: f32[16,16], index: 11, kind: input, shape index: {}]   ;;  %s6109_s12 = inlined_call_operand.vmem [shape: f32[16,16], index: 12, kind: input, shape index: {}, may-alias: {10,12}]   ;;  %s6110_s13 = inlined_call_operand.vmem [shape: f32[16,16], index: 13, kind: input, shape index: {}]   ;;  %s6111_s14 = inlined_call_operand.vmem [shape: f32[16,16], index: 14, kind: input, shape index: {}, may-alias: {8,14}]   ;;  %s6112_s15 = inlined_call_operand.vmem [shape: f32[16,16], index: 15, kind: input, shape index: {}]   ;;  %s6113_s16 = inlined_call_operand.hbm [shape: f32[2,4,16,16], index: 16, kind: output, shape index: {0}]   ;;  %s6114_s17 = inlined_call_operand.hbm [shape: f32[2,4,16,16], index: 17, kind: output, shape index: {1}]   ;;  %s6115_s18 = inlined_call_operand.vmem [shape: f32[2,16,16], index: 18, kind: output, shape index: {2}]   ;;  %s6116_s19 = inlined_call_operand.vmem [shape: f32[2,16,16], index: 19, kind: output, shape index: {3}]  }
   0x1   :  { %6140 = sst [smem:[#allocation27_spill]] %s6097_s0 }
   0x2   :  { %6141 = sst [smem:[#allocation28_spill]] %s6098_s1  ;;  %s6152_s20 = sld [smem:[#allocation27_spill]] }
   0x3   :  { %6142 = sst [smem:[#allocation29_spill]] %s6099_s2 }
   0x4   :  { %6143 = sst [smem:[#allocation30_spill]] %s6100_s3 }
   0x5   :  { %6144 = sst [smem:[#allocation31_spill]] %s6101_s4 }
   0x6   :  { %6145 = sst [smem:[#allocation32_spill]] %s6106_s9 }
   0x7   :  { %6146 = sst [smem:[#allocation33_spill]] %s6109_s12 }
   0x8   :  { %6147 = sst [smem:[#allocation34_spill]] %s6110_s13 }
   0x9   :  { %6148 = sst [smem:[#allocation35_spill]] %s6111_s14 }
   0xa   :  { %6149 = sst [smem:[#allocation36_spill]] %s6112_s15 }
   0xb   :  { %6150 = sst [smem:[#allocation37_spill]] %s6113_s16 }
   0xc   :  { %6151 = sst [smem:[#allocation38_spill]] %s6114_s17 }
   0xd   :  { %25 = sst [smem:[#allocation7]] %s6152_s20 }
   0xe   :  { %26 = vsyncpa [#allocation9], 0 }
   0xf   :  { %28 = vsyncpa [#allocation9 + $0x1], 0 }
  0x10   :  { %29 = vsyncpa [#allocation11], 0 }
  0x11   :  { %31 = vsyncpa [#allocation11 + $0x1], 0  ;;  %s5222_s21 = smov 0   ;;  %s5224_s1 = smov 0  }
  0x12   :  { %s5226_s22 = smov 0   ;;  %s5228_s2 = smov 0  }
  0x13   :  { %s5230_s23 = smov 0   ;;  %s5232_s24 = smov 0  }
  0x14   :  { %s5234_s25 = smov 0   ;;  %s5236_s3 = smov 0  }
  0x15 LB: > { %6153 = sst [smem:[#allocation14_spill]] %s5085_s21  ;;  %s4205_s26 = sadd.s32 4294967295, %s5113_s3   ;;  %s5113_s3 = sphi %s5236_s3, %s37_s3   ;;  %s5109_s25 = sphi %s5234_s25, %s6196_s25   ;;  %s5105_s24 = sphi %s5232_s24, %s6195_s24   ;;  %s5101_s23 = sphi %s5230_s23, %s6194_s23   ;;  %s5097_s2 = sphi %s5228_s2, %s6193_s2   ;;  %s5093_s22 = sphi %s5226_s22, %s6192_s22   ;;  %s5089_s1 = sphi %s5224_s1, %s6191_s1   ;;  %s5085_s21 = sphi %s5222_s21, %s6190_s21  }
  0x16   : > { %6154 = sst [smem:[#allocation15_spill]] %s5089_s1  ;;  %s4206_s27 = sadd.s32 4294967294, %s5113_s3  }
  0x17   : > { %6155 = sst [smem:[#allocation16_spill]] %s5093_s22  ;;  %s46_s28 = sadd.s32 1, %s5105_s24 }
  0x18   : > { %6156 = sst [smem:[#allocation17_spill]] %s5101_s23  ;;  %p47_p0 = scmp.ge.s32.totalorder %s46_s28, 8 }
  0x19   : > { %6157 = sst [smem:[#allocation18_spill]] %s5105_s24  ;;  %s49_s29 = sadd.s32 1, %s5109_s25 }
  0x1a   : > { %6158 = sst [smem:[#allocation19_spill]] %s5109_s25  ;;  %p416_p1 = scmp.ne.s32.totalorder %s5093_s22, %s5089_s1 }
  0x1b   : > { %6159 = sst [smem:[#allocation20_spill]] %s5113_s3  ;;  %p417_p2 = scmp.eq.s32.totalorder %s4205_s26, 15 }
  0x1c   : > { %s6198_s28 = smov (%p47_p0, %s46_s28), 0  ;;  %s6200_s29 = smov (!%p47_p0, %s49_s29), %s5109_s25 }
  0x1d   : > { %6160 = sst [smem:[#allocation21_spill]] %s6198_s28  ;;  %p5271_p3 = por %p417_p2, %p416_p1 }
  0x1e   : > { %p422_p4 = scmp.ne.s32.totalorder %s5089_s1, %s5085_s21  ;;  %p51_p5 = scmp.ge.s32.totalorder %s6200_s29, 2 }
  0x1f   : > { %s6161_s0 = scalar_select %p5271_p3, 1, 0 }
  0x20   : > { %p423_p6 = scmp.eq.s32.totalorder %s4206_s27, 15  ;;  %p4209_p7 = scmp.ge.s32.totalorder %s5113_s3, 1 }
  0x21   : > { %6162 = sst [smem:[#allocation22_spill]] %s6161_s0  ;;  %p599_p8 = scmp.lt.s32.totalorder %s5113_s3, 17 }
  0x22   : > { %s6202_s29 = smov (%p51_p5, %s6200_s29), 0  ;;  %p5281_p9 = por %p423_p6, %p422_p4 }
  0x23   : > { %6163 = sst [smem:[#allocation23_spill]] %s6202_s29  ;;  %p600_p10 = pnand %p4209_p7, %p599_p8 }
  0x24   : > { %s6164_s30 = scalar_select %p5281_p9, 1, 0 }
  0x25   : > { %s403_s20 = ssub.s32 %s5109_s25, %s6202_s29  ;;  %s406_s26 = sadd.s32 1, %s5093_s22 }
  0x26   : > { %6165 = sst [smem:[#allocation24_spill]] %s6164_s30  ;;  %p404_p11 = scmp.eq.s32.totalorder %s403_s20, 0 }
  0x27   : > { %603 = sbr.rel (%p600_p10) target bundleno = 1776 (0x6f0), region = 80 }
  0x28   : > { %s5289_s28 = scalar_select %p404_p11, %s5093_s22, %s406_s26  }
  0x2a   : > { %6166 = sst [smem:[#allocation25_spill]] %s5289_s28 }
  0x2e   : > { %s5292_s27 = sand.u32 1, %s5089_s1   ;;  %p698_p12 = scmp.lt.s32.totalorder %s5101_s23, 1 }
  0x2f   : > { %6167 = sst [smem:[#allocation26_spill]] %s5292_s27  ;;  %s4210_s24 = sshll.u32 %s5292_s27, 6 }
  0x30   : > { %s699_s21 = scalar_select %p698_p12, %s5101_s23, 1 }
  0x31   : > { %s6168_s0 = sld [smem:[#allocation28_spill]]  ;;  %s6169_s26 = sld [smem:[#allocation29_spill]] }
  0x32   : > { %s4336_s3 = sshll.u32 %s699_s21, 4  ;;  %s4338_s17 = sshll.u32 %s699_s21, 6 }
  0x33   : > { %s6170_s14 = sld [smem:[#allocation30_spill]]  ;;  %s6171_s4 = sld [smem:[#allocation31_spill]] }
  0x34   : > { %s5316_s9 = scalar_lea.vmem %s6102_s5, %s4338_s17  ;;  %s5321_s25 = scalar_lea.vmem %s6103_s6, %s4338_s17 }
  0x35   : > { %s5331_s12 = scalar_lea.vmem %s6115_s18, %s4336_s3  ;;  %s5336_s23 = scalar_lea.vmem %s6116_s19, %s4336_s3 }
  0x36   : > { %s5338_s21 = scalar_lea.vmem [#allocation8], %s4210_s24  ;;  %s5340_s16 = scalar_lea.vmem [#allocation10], %s4210_s24 }
  0x37   : > { %s702_s29 = scalar_lea.vmem %s6168_s0, %s4336_s3  ;;  %s707_s28 = scalar_lea.vmem %s6169_s26, %s4336_s3 }
  0x38   : > { %p4230_p13 = scmp.ne.s32.totalorder %s5097_s2, 0 }
  0x39   : > { %s5306_s13 = scalar_lea.vmem %s6170_s14, %s4338_s17  ;;  %s5311_s27 = scalar_lea.vmem %s6171_s4, %s4338_s17  ;;  %v747_v0 = vld [vmem:[%s702_s29] sm:$0xff] (!%p4230_p13)  ;;  %vm749_vm0 = vcmask (!%p4230_p13), 130048   ;;  %v748_v1 = vld [vmem:[%s702_s29 + $0x8] sm:$0xff] (!%p4230_p13) }
  0x3a   : > { %s5326_s14 = scalar_lea.vmem %s6104_s7, %s4338_s17  ;;  %746 = sbr.rel (%p4230_p13) target bundleno = 68 (0x44), region = 84  ;;  %v752_v2 = vld [vmem:[%s707_s28] sm:$0xff] (!%p4230_p13)  ;;  %750 = vst.msk [vmem:[#allocation4] sm:$0xff] (!%p4230_p13), %vm749_vm0, %v747_v0  ;;  %751 = vst.msk [vmem:[#allocation4 + $0x8] sm:$0xff] (!%p4230_p13), %vm749_vm0, %v748_v1  ;;  %v753_v3 = vld [vmem:[%s707_s28 + $0x8] sm:$0xff] (!%p4230_p13) }
  0x3b   : > { %754 = vst.msk [vmem:[#allocation5] sm:$0xff] (!%p4230_p13), %vm749_vm0, %v752_v2  ;;  %v756_v4 = vld [vmem:[%s5306_s13] sm:$0xff] (!%p4230_p13)  ;;  %v757_v5 = vld [vmem:[%s5306_s13 + $0x8] sm:$0xff] (!%p4230_p13)  ;;  %755 = vst.msk [vmem:[#allocation5 + $0x8] sm:$0xff] (!%p4230_p13), %vm749_vm0, %v753_v3 }
  0x3c   : > { %764 = vst.msk [vmem:[#allocation2] sm:$0xff] (!%p4230_p13), %vm749_vm0, %v756_v4  ;;  %765 = vst.msk [vmem:[#allocation2 + $0x8] sm:$0xff] (!%p4230_p13), %vm749_vm0, %v757_v5  ;;  %v758_v6 = vld [vmem:[%s5306_s13 + $0x10] sm:$0xff] (!%p4230_p13)  ;;  %v759_v7 = vld [vmem:[%s5306_s13 + $0x18] sm:$0xff] (!%p4230_p13) }
  0x3d   : > { %v760_v8 = vld [vmem:[%s5306_s13 + $0x20] sm:$0xff] (!%p4230_p13)  ;;  %766 = vst.msk [vmem:[#allocation2 + $0x10] sm:$0xff] (!%p4230_p13), %vm749_vm0, %v758_v6  ;;  %767 = vst.msk [vmem:[#allocation2 + $0x18] sm:$0xff] (!%p4230_p13), %vm749_vm0, %v759_v7  ;;  %v761_v9 = vld [vmem:[%s5306_s13 + $0x28] sm:$0xff] (!%p4230_p13) }
  0x3e   : > { %768 = vst.msk [vmem:[#allocation2 + $0x20] sm:$0xff] (!%p4230_p13), %vm749_vm0, %v760_v8  ;;  %v762_v10 = vld [vmem:[%s5306_s13 + $0x30] sm:$0xff] (!%p4230_p13)  ;;  %v763_v11 = vld [vmem:[%s5306_s13 + $0x38] sm:$0xff] (!%p4230_p13)  ;;  %769 = vst.msk [vmem:[#allocation2 + $0x28] sm:$0xff] (!%p4230_p13), %vm749_vm0, %v761_v9 }
  0x3f   : > { %770 = vst.msk [vmem:[#allocation2 + $0x30] sm:$0xff] (!%p4230_p13), %vm749_vm0, %v762_v10  ;;  %771 = vst.msk [vmem:[#allocation2 + $0x38] sm:$0xff] (!%p4230_p13), %vm749_vm0, %v763_v11  ;;  %v772_v12 = vld [vmem:[%s5311_s27] sm:$0xff] (!%p4230_p13)  ;;  %v773_v13 = vld [vmem:[%s5311_s27 + $0x8] sm:$0xff] (!%p4230_p13) }
  0x40   : > { %v774_v14 = vld [vmem:[%s5311_s27 + $0x10] sm:$0xff] (!%p4230_p13)  ;;  %780 = vst.msk [vmem:[#allocation3] sm:$0xff] (!%p4230_p13), %vm749_vm0, %v772_v12  ;;  %781 = vst.msk [vmem:[#allocation3 + $0x8] sm:$0xff] (!%p4230_p13), %vm749_vm0, %v773_v13  ;;  %v775_v15 = vld [vmem:[%s5311_s27 + $0x18] sm:$0xff] (!%p4230_p13) }
  0x41   : > { %782 = vst.msk [vmem:[#allocation3 + $0x10] sm:$0xff] %vm749_vm0, %v774_v14  ;;  %v776_v16 = vld [vmem:[%s5311_s27 + $0x20] sm:$0xff]  ;;  %v777_v17 = vld [vmem:[%s5311_s27 + $0x28] sm:$0xff]  ;;  %783 = vst.msk [vmem:[#allocation3 + $0x18] sm:$0xff] %vm749_vm0, %v775_v15 }
  0x42   : > { %784 = vst.msk [vmem:[#allocation3 + $0x20] sm:$0xff] %vm749_vm0, %v776_v16  ;;  %785 = vst.msk [vmem:[#allocation3 + $0x28] sm:$0xff] %vm749_vm0, %v777_v17  ;;  %v778_v18 = vld [vmem:[%s5311_s27 + $0x30] sm:$0xff]  ;;  %v779_v19 = vld [vmem:[%s5311_s27 + $0x38] sm:$0xff] }
  0x43   : > { %786 = vst.msk [vmem:[#allocation3 + $0x30] sm:$0xff] %vm749_vm0, %v778_v18  ;;  %787 = vst.msk [vmem:[#allocation3 + $0x38] sm:$0xff] %vm749_vm0, %v779_v19 }
  0x44 PF: > { %v5382_v20 = vld [vmem:[%s6107_s10] sm:$0xff]  ;;  %v5387_v21 = vld [vmem:[%s6107_s10 + $0x8] sm:$0xff]  ;;  %vm888_vm1 = vcmask 130048   ;;  %v814_v43 = vld [vmem:[%s5321_s25 + $0x10] sm:$0xff]  ;;  %s6172_s3 = sld [smem:[#allocation32_spill]]  ;;  %s828_s30 = sld [smem:[#allocation7]] }
  0x45   : > { %v812_v22 = vld [vmem:[%s5321_s25] sm:$0xff]  ;;  %v4767_v23 = vpack.c.bf16 %v5387_v21, %v5382_v20  ;;  %v5395_v26 = vld [vmem:[#allocation5] sm:$0xff]  ;;  %v813_v33 = vld [vmem:[%s5321_s25 + $0x8] sm:$0xff]  ;;  %s6174_s1 = sld [smem:[#allocation33_spill]]  ;;  %p4327_p0 = scmp.ne.s32.totalorder %s5097_s2, 7 }
  0x46   : > { %v820_v24 = vld [vmem:[%s5326_s14] sm:$0xff]  ;;  %v965_v29 = vmul.f32 %v5395_v26, %v812_v22  ;;  %v821_v36 = vld [vmem:[%s5326_s14 + $0x8] sm:$0xff]  ;;  %v5409_v38 = vld [vmem:[#allocation5 + $0x8] sm:$0xff]  ;;  %v967_v16 = vmul.f32 %v5395_v26, %v814_v43 }
  0x47   : > { %v5393_v25 = vld [vmem:[#allocation4] sm:$0xff]  ;;  %v949_v28 = vmul.f32 %v5395_v26, %v820_v24  ;;  %4768 = vmatprep.subr.bf16.mxu0 %v4767_v23  ;;  %4887 = vmatprep.subr.bf16.mxu1 %v4767_v23  ;;  %v5407_v37 = vld [vmem:[#allocation4 + $0x8] sm:$0xff]  ;;  %v950_v46 = vmul.f32 %v5409_v38, %v821_v36  ;;  %v822_v47 = vld [vmem:[%s5326_s14 + $0x10] sm:$0xff]  ;;  %v966_v50 = vmul.f32 %v5409_v38, %v813_v33 }
  0x48   : > { %v941_v27 = vmul.f32 %v5393_v25, %v812_v22  ;;  %v973_v30 = vmul.f32 %v5393_v25, %v820_v24  ;;  %v816_v31 = vld [vmem:[%s5321_s25 + $0x20] sm:$0xff]  ;;  %4770 = vmatpush3.bf16.msra.mxu0 %v4767_v23  ;;  %4888 = vmatpush3.bf16.msra.mxu1 %v4767_v23  ;;  %v817_v41 = vld [vmem:[%s5321_s25 + $0x28] sm:$0xff]  ;;  %v942_v45 = vmul.f32 %v5407_v37, %v813_v33  ;;  %v818_v48 = vld [vmem:[%s5321_s25 + $0x30] sm:$0xff] }
  0x49   : > { %v824_v32 = vld [vmem:[%s5326_s14 + $0x20] sm:$0xff]  ;;  %v945_v34 = vmul.f32 %v5393_v25, %v816_v31  ;;  %v825_v42 = vld [vmem:[%s5326_s14 + $0x28] sm:$0xff]  ;;  %v826_v49 = vld [vmem:[%s5326_s14 + $0x30] sm:$0xff]  ;;  %v974_v51 = vmul.f32 %v5407_v37, %v821_v36  ;;  %v946_v52 = vmul.f32 %v5407_v37, %v817_v41  ;;  %v943_v57 = vmul.f32 %v5393_v25, %v814_v43 }
  0x4a   : > { %v953_v35 = vmul.f32 %v5395_v26, %v824_v32  ;;  %v957_v39 = vsub.f32 %v941_v27, %v949_v28  ;;  %v981_v40 = vadd.f32 %v973_v30, %v965_v29  ;;  %v815_v53 = vld [vmem:[%s5321_s25 + $0x18] sm:$0xff]  ;;  %v958_v55 = vsub.f32 %v942_v45, %v950_v46  ;;  %v995_v1 = vld [vmem:[%s6108_s11] sm:$0xff]  ;;  %v996_v6 = vld [vmem:[%s6108_s11 + $0x8] sm:$0xff]  ;;  %s6173_s28 = smov %s6172_s3  ;;  %s870_s20 = ssub.f32 1.0, %s828_s30 }
  0x4b   : > { %v823_v54 = vld [vmem:[%s5326_s14 + $0x18] sm:$0xff]  ;;  %v954_v56 = vmul.f32 %v5409_v38, %v825_v42  ;;  %v951_v58 = vmul.f32 %v5395_v26, %v822_v47  ;;  %v969_v62 = vmul.f32 %v5395_v26, %v816_v31  ;;  %v947_v63 = vmul.f32 %v5393_v25, %v818_v48  ;;  %s6175_s26 = smov %s6174_s1 }
  0x4c   : > { %v5414_v44 = vsub.f32 %v945_v34, %v953_v35  ;;  %4507 = vmatprep.mubr.msk.f32.mxu0 %vm888_vm1, %v957_v39  ;;  %v819_v59 = vld [vmem:[%s5321_s25 + $0x38] sm:$0xff]  ;;  %v1013_v61 = vadd.f32 %v981_v40, %v957_v39  ;;  %v955_v0 = vmul.f32 %v5395_v26, %v826_v49  ;;  %v944_v4 = vmul.f32 %v5407_v37, %v815_v53 }
  0x4d   : > { %v827_v60 = vld [vmem:[%s5326_s14 + $0x38] sm:$0xff]  ;;  %4508 = vmatmul.mubr.msk.f32.vlgmr.msra.gmra.mrb[0].mxu0 %vm888_vm1, %v958_v55  ;;  %v962_v2 = vsub.f32 %v946_v52, %v954_v56  ;;  %v959_v3 = vsub.f32 %v943_v57, %v951_v58  ;;  %v952_v5 = vmul.f32 %v5409_v38, %v823_v54  ;;  %v982_v7 = vadd.f32 %v974_v51, %v966_v50 }
  0x4e   : > { %4513 = vmatprep.mubr.msk.f32.mxu1 %vm888_vm1, %v5414_v44  ;;  %v963_v8 = vsub.f32 %v947_v63, %v955_v0  ;;  %v948_v9 = vmul.f32 %v5407_v37, %v819_v59  ;;  %v956_v10 = vmul.f32 %v5409_v38, %v827_v60  ;;  %v4771_v12 = vpack.c.bf16 %v996_v6, %v995_v1 }
  0x4f   : > { %4514 = vmatmul.mubr.msk.f32.vlgmr.msra.gmra.mrb[0].mxu1 %vm888_vm1, %v962_v2  ;;  %4510 = vmatprep.mubr.msk.f32.mxu0 %vm888_vm1, %v959_v3  ;;  %v960_v11 = vsub.f32 %v944_v4, %v952_v5  ;;  %v1007_v13 = vadd.f32 %v995_v1, %v5382_v20  ;;  %v1008_v15 = vadd.f32 %v996_v6, %v5387_v21 }
  0x50   : > { %4516 = vmatprep.mubr.msk.f32.mxu1 %vm888_vm1, %v963_v8  ;;  %v964_v14 = vsub.f32 %v948_v9, %v956_v10  ;;  %v975_v17 = vmul.f32 %v5393_v25, %v822_v47  ;;  %v977_v18 = vmul.f32 %v5393_v25, %v824_v32  ;;  %4772 = vmatprep.subr.bf16.mxu1 %v4771_v12 }
  0x51   : > { %4511 = vmatmul.mubr.msk.f32.gmra.mrb[2].mxu0 %vm888_vm1, %v960_v11  ;;  %v968_v19 = vmul.f32 %v5409_v38, %v815_v53  ;;  %v976_v22 = vmul.f32 %v5407_v37, %v823_v54  ;;  %v4775_v23 = vpack.c.bf16 %v1008_v15, %v1007_v13  ;;  %4774 = vmatpush3.bf16.msra.mxu1 %v4771_v12  ;;  %v5504_v12 = vld [vmem:[%s6172_s3] sm:$0xff]  ;;  %s6176_s3 = sld [smem:[#allocation34_spill]] }
  0x52   : > { %4539 = vmatprep.mubr.msk.f32.mxu0 %vm888_vm1, %v1013_v61  ;;  %v983_v20 = vadd.f32 %v975_v17, %v967_v16  ;;  %v1014_v24 = vadd.f32 %v982_v7, %v958_v55  ;;  %v970_v27 = vmul.f32 %v5409_v38, %v817_v41  ;;  %v978_v28 = vmul.f32 %v5407_v37, %v825_v42  ;;  %v5486_v41 = vld [vmem:[%s6105_s8] sm:$0xff] }
  0x53   : > { %4517 = vmatmul.mubr.msk.f32.gmra.mrb[2].mxu1 %vm888_vm1, %v964_v14  ;;  %4776 = vmatprep.subr.bf16.mxu0 %v4775_v23  ;;  %v984_v21 = vadd.f32 %v976_v22, %v968_v19  ;;  %v985_v29 = vadd.f32 %v977_v18, %v969_v62  ;;  %v971_v31 = vmul.f32 %v5395_v26, %v818_v48 }
  0x54   : > { %4523 = vmatprep.mubr.msk.f32.mxu1 %vm888_vm1, %v981_v40  ;;  %4778 = vmatpush3.bf16.msra.mxu0 %v4775_v23  ;;  %v1015_v30 = vadd.f32 %v983_v20, %v959_v3  ;;  %v979_v32 = vmul.f32 %v5393_v25, %v826_v49  ;;  %v972_v33 = vmul.f32 %v5409_v38, %v819_v59 }
  0x55   : > { %v1016_v34 = vadd.f32 %v984_v21, %v960_v11  ;;  %v986_v35 = vadd.f32 %v978_v28, %v970_v27  ;;  %v980_v36 = vmul.f32 %v5407_v37, %v827_v60  ;;  %v1017_v39 = vadd.f32 %v985_v29, %v5414_v44  ;;  %v5517_v27 = vld [vmem:[%s6173_s28 + $0x8] sm:$0xff] }
  0x56   : > { %v987_v40 = vadd.f32 %v979_v32, %v971_v31 }
  0x57   : > { %4524 = vmatmul.mubr.msk.f32.vlgmr.msra.gmra.mrb[4].mxu1 %vm888_vm1, %v982_v7  ;;  %4540 = vmatmul.mubr.msk.f32.vlgmr.msra.gmra.mrb[4].mxu0 %vm888_vm1, %v1014_v24  ;;  %v1018_v25 = vadd.f32 %v986_v35, %v962_v2  ;;  %v988_v26 = vadd.f32 %v980_v36, %v972_v33  ;;  %s6177_s29 = smov %s6176_s3 }
  0x58   : > { %4526 = vmatprep.mubr.msk.f32.mxu1 %vm888_vm1, %v983_v20  ;;  %4542 = vmatprep.mubr.msk.f32.mxu0 %vm888_vm1, %v1015_v30  ;;  %v1019_v38 = vadd.f32 %v987_v40, %v963_v8  ;;  %v5497_v8 = vld [vmem:[%s6105_s8 + $0x8] sm:$0xff]  ;;  %v5510_v20 = vadd.f32 %v5504_v12, %v5486_v41 }
  0x59   : > { %v1020_v37 = vadd.f32 %v988_v26, %v964_v14 }
  0x5b   : > { %4527 = vmatmul.mubr.msk.f32.gmra.mrb[6].mxu1 %vm888_vm1, %v984_v21  ;;  %4543 = vmatmul.mubr.msk.f32.gmra.mrb[6].mxu0 %vm888_vm1, %v1016_v34 }
  0x5c   : > { %4529 = vmatprep.mubr.msk.f32.mxu1 %vm888_vm1, %v985_v29  ;;  %4545 = vmatprep.mubr.msk.f32.mxu0 %vm888_vm1, %v1017_v39 }
  0x5f   : > { %4530 = vmatmul.mubr.msk.f32.gmra.mrb[8].mxu1 %vm888_vm1, %v986_v35  ;;  %4546 = vmatmul.mubr.msk.f32.gmra.mrb[8].mxu0 %vm888_vm1, %v1018_v25 }
  0x60   : > { %4532 = vmatprep.mubr.msk.f32.mxu1 %vm888_vm1, %v987_v40  ;;  %4548 = vmatprep.mubr.msk.f32.mxu0 %vm888_vm1, %v1019_v38  ;;  %v5532_v38 = vadd.f32 %v5517_v27, %v5497_v8 }
  0x63   : > { %4533 = vmatmul.mubr.msk.f32.gmra.mrb[10].mxu1 %vm888_vm1, %v988_v26  ;;  %4549 = vmatmul.mubr.msk.f32.gmra.mrb[10].mxu0 %vm888_vm1, %v1020_v37 }
  0x64   : > { %4555 = vmatprep.mubr.msk.f32.mxu1 %vm888_vm1, %v5486_v41 }
 0x120   : > { %v4509_v42 = vpop.f32.mrb[0].mxu0 }
 0x121   : > { %v1111_v43 = vpop.f32.mrb[1].mxu0 }
 0x122   : > { %v4515_v44 = vpop.f32.mrb[0].mxu1 }
 0x123   : > { %v1131_v45 = vpop.f32.mrb[1].mxu1 }
 0x124   : > { %v4512_v46 = vpop.f32.mrb[2].mxu0 }
 0x125   : > { %v1121_v47 = vpop.f32.mrb[3].mxu0 }
 0x126   : > { %v5490_v48 = vpop.f32.mrb[2].mxu1 }
 0x127   : > { %v5492_v49 = vpop.f32.mrb[3].mxu1 }
 0x12a   : > { %v4525_v50 = vpop.f32.mrb[4].mxu1  ;;  %v4541_v52 = vpop.f32.mrb[4].mxu0 }
 0x12b   : > { %v1409_v51 = vsub.f32 %v4509_v42, %v4525_v50  ;;  %v1240_v53 = vpop.f32.mrb[5].mxu1  ;;  %v1417_v54 = vsub.f32 %v4541_v52, %v4509_v42  ;;  %v1369_v56 = vpop.f32.mrb[5].mxu0  ;;  %v5550_v52 = vld [vmem:[%s5316_s9 + $0x8] sm:$0xff] }
 0x12c   : > { %v1408_v55 = vsub.f32 %v1111_v43, %v1240_v53  ;;  %v1416_v57 = vsub.f32 %v1369_v56, %v1111_v43  ;;  %v788_v56 = vld [vmem:[%s5316_s9] sm:$0xff] }
 0x12d   : > { %v1425_v58 = vsub.f32 %v1417_v54, %v4525_v50  ;;  %v5553_v54 = vstv %s828_s30 }
 0x12e   : > { %v4779_v59 = vpack.c.bf16 %v1409_v51, %v1408_v55  ;;  %v4528_v60 = vpop.f32.mrb[6].mxu1  ;;  %v1424_v61 = vsub.f32 %v1416_v57, %v1240_v53  ;;  %v4544_v63 = vpop.f32.mrb[6].mxu0  ;;  %v830_v53 = vsub.f32 1.0, %v5550_v52  ;;  %v797_v57 = vld [vmem:[%s5306_s13 + $0x8] sm:$0xff] }
 0x12f   : > { %v1411_v62 = vsub.f32 %v4512_v46, %v4528_v60  ;;  %v1250_v0 = vpop.f32.mrb[7].mxu1  ;;  %v1433_v1 = vadd.f32 %v1425_v58, %v1409_v51  ;;  %v1419_v2 = vsub.f32 %v4544_v63, %v4512_v46  ;;  %v1379_v4 = vpop.f32.mrb[7].mxu0 }
 0x130   : > { %v1410_v3 = vsub.f32 %v1121_v47, %v1250_v0  ;;  %4780 = vmatprep.subr.bf16.mxu1 %v4779_v59  ;;  %v1432_v5 = vadd.f32 %v1424_v61, %v1408_v55  ;;  %v1418_v6 = vsub.f32 %v1379_v4, %v1121_v47  ;;  %v4783_v7 = vpack.c.bf16 %v1425_v58, %v1424_v61  ;;  %v855_v58 = vld [vmem:[#allocation2 + $0x8] sm:$0xff] }
 0x131   : > { %4782 = vmatpush3.bf16.msra.mxu1 %v4779_v59  ;;  %v1427_v9 = vsub.f32 %v1419_v2, %v4528_v60  ;;  %v839_v55 = vmul.f32 %v5553_v54, %v5550_v52  ;;  %v5559_v59 = vstv %s870_s20  ;;  %v796_v60 = vld [vmem:[%s5306_s13] sm:$0xff]  ;;  %v829_v61 = vsub.f32 1.0, %v788_v56  ;;  %v805_v2 = vld [vmem:[%s5311_s27 + $0x8] sm:$0xff] }
 0x132   : > { %v5499_v10 = vpack.c.bf16 %v1411_v62, %v1410_v3  ;;  %v4531_v11 = vpop.f32.mrb[8].mxu1  ;;  %v1426_v13 = vsub.f32 %v1418_v6, %v1250_v0  ;;  %v4547_v15 = vpop.f32.mrb[8].mxu0  ;;  %4784 = vmatprep.subr.bf16.mxu1 %v4783_v7  ;;  %v4787_v17 = vpack.c.bf16 %v1433_v1, %v1432_v5  ;;  %v873_v0 = vmul.f32 %v5559_v59, %v797_v57  ;;  %v854_v1 = vld [vmem:[#allocation2] sm:$0xff] }
 0x133   : > { %v1413_v14 = vsub.f32 %v4515_v44, %v4531_v11  ;;  %v1260_v16 = vpop.f32.mrb[9].mxu1  ;;  %v1947_v18 = vadd.f32 %v1427_v9, %v1411_v62  ;;  %v1421_v19 = vsub.f32 %v4547_v15, %v4515_v44  ;;  %v1389_v23 = vpop.f32.mrb[9].mxu0  ;;  %v838_v62 = vmul.f32 %v5553_v54, %v788_v56 }
 0x134   : > { %v1412_v22 = vsub.f32 %v1131_v45, %v1260_v16  ;;  %4556 = vmatmul.mubr.msk.f32.vlgmr.msra.gmra.mrb[12].mxu1 %vm888_vm1, %v5497_v8  ;;  %v1946_v24 = vadd.f32 %v1426_v13, %v1410_v3  ;;  %v1420_v21 = vsub.f32 %v1389_v23, %v1131_v45  ;;  %v5519_v28 = vpack.c.bf16 %v1427_v9, %v1426_v13  ;;  %v898_v3 = vld [vmem:[#allocation3 + $0x8] sm:$0xff]  ;;  %v5576_v23 = vld [vmem:[%s6174_s1] sm:$0xff] }
 0x135   : > { %4786 = vmatpush3.bf16.msra.mxu1 %v4783_v7  ;;  %4562 = vmatprep.mubr.msk.f32.mxu1 %vm888_vm1, %v5504_v12  ;;  %v1429_v29 = vsub.f32 %v1421_v19, %v4531_v11  ;;  %v847_v63 = vadd.f32 %v839_v55, %v830_v53  ;;  %v846_v4 = vadd.f32 %v838_v62, %v829_v61 }
 0x136   : > { %v5521_v30 = vpack.c.bf16 %v1413_v14, %v1412_v22  ;;  %v4534_v31 = vpop.f32.mrb[10].mxu1  ;;  %4788 = vmatprep.subr.bf16.mxu1 %v4787_v17  ;;  %v1428_v32 = vsub.f32 %v1420_v21, %v1260_v16  ;;  %v4550_v34 = vpop.f32.mrb[10].mxu0  ;;  %v5524_v36 = vpack.c.bf16 %v1947_v18, %v1946_v24  ;;  %v872_v5 = vmul.f32 %v5559_v59, %v796_v60  ;;  %v804_v16 = vld [vmem:[%s5311_s27] sm:$0xff] }
 0x137   : > { %v1415_v33 = vsub.f32 %v5490_v48, %v4534_v31  ;;  %v1270_v35 = vpop.f32.mrb[11].mxu1  ;;  %v2425_v39 = vadd.f32 %v1429_v29, %v1413_v14  ;;  %v1423_v40 = vsub.f32 %v4550_v34, %v5490_v48  ;;  %v1399_v26 = vpop.f32.mrb[11].mxu0  ;;  %v914_v6 = vmul.f32 %v5559_v59, %v805_v2  ;;  %v5583_v24 = vld [vmem:[%s6176_s3] sm:$0xff]  ;;  %s6179_s3 = sld [smem:[#allocation36_spill]] }
 0x138   : > { %v1414_v25 = vsub.f32 %v5492_v49, %v1270_v35  ;;  %4563 = vmatmul.mubr.msk.f32.vlgmr.msra.gmra.mrb[14].mxu1 %vm888_vm1, %v5517_v27  ;;  %v2424_v37 = vadd.f32 %v1428_v32, %v1412_v22  ;;  %v1422_v42 = vsub.f32 %v1399_v26, %v5492_v49  ;;  %v5537_v43 = vpack.c.bf16 %v1429_v29, %v1428_v32 }
 0x139   : > { %4790 = vmatpush3.bf16.msra.mxu1 %v4787_v17  ;;  %4569 = vmatprep.mubr.msk.f32.mxu1 %vm888_vm1, %v5510_v20  ;;  %v1431_v44 = vsub.f32 %v1423_v40, %v4534_v31  ;;  %v863_v7 = vmul.f32 %v855_v58, %v847_v63  ;;  %v906_v9 = vmul.f32 %v898_v3, %v847_v63  ;;  %v897_v17 = vld [vmem:[#allocation3] sm:$0xff] }
 0x13a   : > { %v5539_v45 = vpack.c.bf16 %v1415_v33, %v1414_v25  ;;  %v1430_v46 = vsub.f32 %v1422_v42, %v1270_v35  ;;  %v5541_v47 = vpack.c.bf16 %v2425_v39, %v2424_v37  ;;  %v862_v11 = vmul.f32 %v854_v1, %v846_v4  ;;  %4583 = vmatprep.mubr.msk.f32.mxu0 %vm888_vm1, %v5583_v24 }
 0x13b   : > { %v2903_v48 = vadd.f32 %v1431_v44, %v1415_v33  ;;  %v881_v13 = vadd.f32 %v873_v0, %v863_v7  ;;  %v922_v14 = vadd.f32 %v914_v6, %v906_v9  ;;  %v905_v18 = vmul.f32 %v897_v17, %v846_v4  ;;  %v799_v6 = vld [vmem:[%s5306_s13 + $0x18] sm:$0xff] }
 0x13c   : > { %4570 = vmatmul.mubr.msk.f32.vlgmr.msra.gmra.mrb[16].mxu1 %vm888_vm1, %v5532_v38  ;;  %v2902_v49 = vadd.f32 %v1430_v46, %v1414_v25  ;;  %v5545_v50 = vpack.c.bf16 %v1431_v44, %v1430_v46  ;;  %v880_v15 = vadd.f32 %v872_v5, %v862_v11  ;;  %v913_v19 = vmul.f32 %v5559_v59, %v804_v16  ;;  %v857_v7 = vld [vmem:[#allocation2 + $0x18] sm:$0xff] }
 0x13d   : > { %890 = vst.msk [vmem:[#allocation2 + $0x8] sm:$0xff] %vm888_vm1, %v881_v13  ;;  %930 = vst.msk [vmem:[#allocation3 + $0x8] sm:$0xff] %vm888_vm1, %v922_v14  ;;  %4576 = vmatprep.mubr.msk.f32.mxu1 %vm888_vm1, %v5576_v23  ;;  %v875_v11 = vmul.f32 %v5559_v59, %v799_v6  ;;  %v807_v13 = vld [vmem:[%s5311_s27 + $0x18] sm:$0xff]  ;;  %s6180_s0 = smov %s6179_s3 }
 0x13e   : > { %v5547_v51 = vpack.c.bf16 %v2903_v48, %v2902_v49  ;;  %889 = vst.msk [vmem:[#allocation2] sm:$0xff] %vm888_vm1, %v880_v15  ;;  %v921_v22 = vadd.f32 %v913_v19, %v905_v18  ;;  %v900_v14 = vld [vmem:[#allocation3 + $0x18] sm:$0xff]  ;;  %v916_v15 = vmul.f32 %v5559_v59, %v807_v13  ;;  %v790_v18 = vld [vmem:[%s5316_s9 + $0x10] sm:$0xff] }
 0x140   : > { %929 = vst.msk [vmem:[#allocation3] sm:$0xff] %vm888_vm1, %v921_v22 }
 0x207   : > { %v4557_v21 = vpop.f32.mrb[12].mxu1 }
 0x208   : > { %v1506_v29 = vpop.f32.mrb[13].mxu1 }
 0x20b   : > { %v4564_v31 = vpop.f32.mrb[14].mxu1 }
 0x20c   : > { %v1678_v32 = vsub.f32 %v4557_v21, %v4564_v31  ;;  %v1587_v33 = vpop.f32.mrb[15].mxu1 }
 0x20d   : > { %v1677_v34 = vsub.f32 %v1506_v29, %v1587_v33 }
 0x20e   : > { %v1684_v35 = vmul.f32 %v1678_v32, %v5550_v52  ;;  %v856_v32 = vld [vmem:[#allocation2 + $0x10] sm:$0xff] }
 0x20f   : > { %v1683_v39 = vmul.f32 %v1677_v34, %v788_v56  ;;  %v4571_v40 = vpop.f32.mrb[16].mxu1  ;;  %v899_v34 = vld [vmem:[#allocation3 + $0x10] sm:$0xff] }
 0x210   : > { %v1686_v25 = vsub.f32 %v797_v57, %v1684_v35  ;;  %v1680_v26 = vsub.f32 %v4571_v40, %v4557_v21  ;;  %v1668_v37 = vpop.f32.mrb[17].mxu1  ;;  %v5594_v57 = vld [vmem:[%s6175_s26 + $0x8] sm:$0xff]  ;;  %v798_v21 = vld [vmem:[%s5306_s13 + $0x10] sm:$0xff] }
 0x211   : > { %v1685_v42 = vsub.f32 %v796_v60, %v1683_v39  ;;  %v1679_v44 = vsub.f32 %v1668_v37, %v1506_v29  ;;  %v5598_v60 = vadd.f32 %v5583_v24, %v5576_v23  ;;  %v831_v29 = vsub.f32 1.0, %v790_v18 }
 0x212   : > { %v1682_v46 = vsub.f32 %v1680_v26, %v4564_v31  ;;  %v1688_v48 = vmul.f32 %v1686_v25, %v5550_v52  ;;  %v840_v31 = vmul.f32 %v5553_v54, %v790_v18  ;;  %v874_v39 = vmul.f32 %v5559_v59, %v798_v21 }
 0x213   : > { %v1681_v49 = vsub.f32 %v1679_v44, %v1587_v33  ;;  %v1687_v53 = vmul.f32 %v1685_v42, %v788_v56  ;;  %v806_v33 = vld [vmem:[%s5311_s27 + $0x10] sm:$0xff] }
 0x214   : > { %v1690_v55 = vmul.f32 %v1682_v46, %v5550_v52  ;;  %v848_v35 = vadd.f32 %v840_v31, %v831_v29  ;;  %v915_v40 = vmul.f32 %v5559_v59, %v806_v33 }
 0x215   : > { %v1689_v58 = vmul.f32 %v1681_v49, %v788_v56  ;;  %v4791_v61 = vpack.c.bf16 %v1688_v48, %v1687_v53 }
 0x216   : > { %v1692_v62 = vsub.f32 %v805_v2, %v1690_v55  ;;  %v864_v25 = vmul.f32 %v856_v32, %v848_v35  ;;  %v907_v26 = vmul.f32 %v899_v34, %v848_v35 }
 0x217   : > { %v1691_v63 = vsub.f32 %v804_v16, %v1689_v58  ;;  %4792 = vmatprep.subr.bf16.mxu1 %v4791_v61 }
 0x218   : > { %4794 = vmatpush3.bf16.msra.mxu1 %v4791_v61  ;;  %v1694_v0 = vmul.f32 %v1692_v62, %v5550_v52  ;;  %v5605_v52 = vld [vmem:[%s6177_s29 + $0x8] sm:$0xff]  ;;  %v882_v37 = vadd.f32 %v874_v39, %v864_v25  ;;  %v923_v42 = vadd.f32 %v915_v40, %v907_v26 }
 0x219   : > { %v1693_v1 = vmul.f32 %v1691_v63, %v788_v56  ;;  %v5612_v56 = vadd.f32 %v5605_v52, %v5594_v57 }
 0x21a   : > { %v1696_v3 = vadd.f32 %v1694_v0, %v1688_v48  ;;  %891 = vst.msk [vmem:[#allocation2 + $0x10] sm:$0xff] %vm888_vm1, %v882_v37  ;;  %931 = vst.msk [vmem:[#allocation3 + $0x10] sm:$0xff] %vm888_vm1, %v923_v42 }
 0x21b   : > { %v4795_v4 = vpack.c.bf16 %v1694_v0, %v1693_v1  ;;  %v1695_v5 = vadd.f32 %v1693_v1, %v1687_v53  ;;  %4577 = vmatmul.mubr.msk.f32.vlgmr.msra.gmra.mrb[18].mxu1 %vm888_vm1, %v5594_v57 }
 0x21c   : > { %4590 = vmatprep.mubr.msk.f32.mxu1 %vm888_vm1, %v5598_v60 }
 0x21d   : > { %4796 = vmatprep.subr.bf16.mxu0 %v4795_v4  ;;  %v4799_v2 = vpack.c.bf16 %v1696_v3, %v1695_v5 }
 0x21e   : > { %4798 = vmatpush3.bf16.msra.mxu0 %v4795_v4 }
 0x21f   : > { %4800 = vmatprep.subr.bf16.mxu1 %v4799_v2  ;;  %4804 = vmatprep.subr.bf16.mxu0 %v5499_v10 }
 0x220   : > { %4802 = vmatpush3.bf16.msra.mxu1 %v4799_v2 }
 0x221   : > { %4584 = vmatmul.mubr.msk.f32.vlgmr.msra.gmra.mrb[12].mxu0 %vm888_vm1, %v5605_v52  ;;  %4808 = vmatprep.subr.bf16.mxu1 %v5519_v28 }
 0x222   : > { %4806 = vmatpush3.bf16.msra.mxu0 %v5499_v10  ;;  %4597 = vmatprep.mubr.msk.f32.mxu0 %vm888_vm1, %v5486_v41  ;;  %v5640_v10 = vld [vmem:[%s5316_s9 + $0x18] sm:$0xff] }
 0x223   : > { %4812 = vmatprep.subr.bf16.mxu0 %v5524_v36  ;;  %4591 = vmatmul.mubr.msk.f32.vlgmr.msra.gmra.mrb[20].mxu1 %vm888_vm1, %v5612_v56 }
 0x224   : > { %4810 = vmatpush3.bf16.msra.mxu1 %v5519_v28  ;;  %4604 = vmatprep.mubr.msk.f32.mxu1 %vm888_vm1, %v5504_v12  ;;  %v832_v28 = vsub.f32 1.0, %v5640_v10 }
 0x225   : > { %4598 = vmatmul.mubr.msk.f32.vlgmr.msra.gmra.mrb[14].mxu0 %vm888_vm1, %v5497_v8 }
 0x226   : > { %4814 = vmatpush3.bf16.msra.mxu0 %v5524_v36  ;;  %4611 = vmatprep.mubr.msk.f32.mxu0 %vm888_vm1, %v5510_v20  ;;  %v841_v36 = vmul.f32 %v5553_v54, %v5640_v10 }
 0x227   : > { %4605 = vmatmul.mubr.msk.f32.vlgmr.msra.gmra.mrb[22].mxu1 %vm888_vm1, %v5517_v27 }
 0x228   : > { %4618 = vmatprep.mubr.msk.f32.mxu1 %vm888_vm1, %v5576_v23  ;;  %v849_v9 = vadd.f32 %v841_v36, %v832_v28 }
 0x229   : > { %4612 = vmatmul.mubr.msk.f32.vlgmr.msra.gmra.mrb[16].mxu0 %vm888_vm1, %v5532_v38 }
 0x22a   : > { %4625 = vmatprep.mubr.msk.f32.mxu0 %vm888_vm1, %v5583_v24  ;;  %v865_v16 = vmul.f32 %v857_v7, %v849_v9  ;;  %v908_v17 = vmul.f32 %v900_v14, %v849_v9 }
 0x22c   : > { %v883_v19 = vadd.f32 %v875_v11, %v865_v16  ;;  %v924_v22 = vadd.f32 %v916_v15, %v908_v17 }
 0x22e   : > { %892 = vst.msk [vmem:[#allocation2 + $0x18] sm:$0xff] %vm888_vm1, %v883_v19  ;;  %932 = vst.msk [vmem:[#allocation3 + $0x18] sm:$0xff] %vm888_vm1, %v924_v22 }
 0x2ee   : > { %v4578_v44 = vpop.f32.mrb[18].mxu1 }
 0x2ef   : > { %v1769_v46 = vpop.f32.mrb[19].mxu1 }
 0x2f4   : > { %v4585_v48 = vpop.f32.mrb[12].mxu0 }
 0x2f5   : > { %v5659_v49 = vsub.f32 %v4578_v44, %v4585_v48  ;;  %v1850_v53 = vpop.f32.mrb[13].mxu0 }
 0x2f6   : > { %v5661_v55 = vsub.f32 %v1769_v46, %v1850_v53  ;;  %v4592_v58 = vpop.f32.mrb[20].mxu1 }
 0x2f7   : > { %v1943_v61 = vsub.f32 %v4592_v58, %v4578_v44  ;;  %v1931_v62 = vpop.f32.mrb[21].mxu1 }
 0x2f8   : > { %v4599_v63 = vpop.f32.mrb[14].mxu0  ;;  %v1942_v0 = vsub.f32 %v1931_v62, %v1769_v46  ;;  %v809_v46 = vld [vmem:[%s5311_s27 + $0x28] sm:$0xff]  ;;  %v792_v62 = vld [vmem:[%s5316_s9 + $0x20] sm:$0xff] }
 0x2f9   : > { %v5663_v1 = vsub.f32 %v1943_v61, %v4585_v48  ;;  %v2014_v3 = vpop.f32.mrb[15].mxu0  ;;  %v902_v48 = vld [vmem:[#allocation3 + $0x28] sm:$0xff] }
 0x2fa   : > { %v5665_v4 = vsub.f32 %v1942_v0, %v1850_v53  ;;  %v4606_v5 = vpop.f32.mrb[22].mxu1  ;;  %v918_v53 = vmul.f32 %v5559_v59, %v809_v46 }
 0x2fb   : > { %v2174_v2 = vsub.f32 %v4599_v63, %v4606_v5  ;;  %v2089_v28 = vpop.f32.mrb[23].mxu1 }
 0x2fc   : > { %v4613_v36 = vpop.f32.mrb[16].mxu0  ;;  %v2173_v7 = vsub.f32 %v2014_v3, %v2089_v28 }
 0x2fd   : > { %v2180_v9 = vmul.f32 %v2174_v2, %v5640_v10  ;;  %v2176_v11 = vsub.f32 %v4613_v36, %v4599_v63  ;;  %v2164_v14 = vpop.f32.mrb[17].mxu0  ;;  %v842_v2 = vmul.f32 %v5553_v54, %v792_v62  ;;  %v808_v36 = vld [vmem:[%s5311_s27 + $0x20] sm:$0xff] }
 0x2fe   : > { %v2179_v15 = vmul.f32 %v2173_v7, %v790_v18  ;;  %v2175_v16 = vsub.f32 %v2164_v14, %v2014_v3  ;;  %v800_v3 = vld [vmem:[%s5306_s13 + $0x20] sm:$0xff]  ;;  %v917_v14 = vmul.f32 %v5559_v59, %v808_v36 }
 0x2ff   : > { %v2182_v17 = vsub.f32 %v799_v6, %v2180_v9  ;;  %v2178_v19 = vsub.f32 %v2176_v11, %v4606_v5  ;;  %v833_v5 = vsub.f32 1.0, %v792_v62  ;;  %v901_v7 = vld [vmem:[#allocation3 + $0x20] sm:$0xff]  ;;  %v876_v11 = vmul.f32 %v5559_v59, %v800_v3 }
 0x300   : > { %v2181_v22 = vsub.f32 %v798_v21, %v2179_v15  ;;  %v2177_v29 = vsub.f32 %v2175_v16, %v2089_v28  ;;  %v858_v28 = vld [vmem:[#allocation2 + $0x20] sm:$0xff] }
 0x301   : > { %v2186_v31 = vmul.f32 %v2178_v19, %v5640_v10  ;;  %v2184_v32 = vmul.f32 %v2182_v17, %v5640_v10  ;;  %v850_v9 = vadd.f32 %v842_v2, %v833_v5 }
 0x302   : > { %v2185_v34 = vmul.f32 %v2177_v29, %v790_v18  ;;  %v2183_v35 = vmul.f32 %v2181_v22, %v790_v18 }
 0x303   : > { %v2188_v39 = vsub.f32 %v807_v13, %v2186_v31  ;;  %v859_v13 = vld [vmem:[#allocation2 + $0x28] sm:$0xff]  ;;  %v866_v15 = vmul.f32 %v858_v28, %v850_v9  ;;  %v909_v16 = vmul.f32 %v901_v7, %v850_v9 }
 0x304   : > { %v2187_v40 = vsub.f32 %v806_v33, %v2185_v34  ;;  %v4815_v25 = vpack.c.bf16 %v2184_v32, %v2183_v35 }
 0x305   : > { %v2190_v26 = vmul.f32 %v2188_v39, %v5640_v10  ;;  %v801_v10 = vld [vmem:[%s5306_s13 + $0x28] sm:$0xff]  ;;  %v884_v17 = vadd.f32 %v876_v11, %v866_v15  ;;  %v925_v19 = vadd.f32 %v917_v14, %v909_v16 }
 0x306   : > { %4816 = vmatprep.subr.bf16.mxu1 %v4815_v25  ;;  %v2189_v37 = vmul.f32 %v2187_v40, %v790_v18  ;;  %v877_v33 = vmul.f32 %v5559_v59, %v801_v10 }
 0x307   : > { %4818 = vmatpush3.bf16.msra.mxu1 %v4815_v25  ;;  %v2192_v42 = vadd.f32 %v2190_v26, %v2184_v32  ;;  %893 = vst.msk [vmem:[#allocation2 + $0x20] sm:$0xff] %vm888_vm1, %v884_v17  ;;  %933 = vst.msk [vmem:[#allocation3 + $0x20] sm:$0xff] %vm888_vm1, %v925_v19 }
 0x308   : > { %v4819_v44 = vpack.c.bf16 %v2190_v26, %v2189_v37  ;;  %v2191_v6 = vadd.f32 %v2189_v37, %v2183_v35 }
 0x30a   : > { %4820 = vmatprep.subr.bf16.mxu0 %v4819_v44  ;;  %v4823_v21 = vpack.c.bf16 %v2192_v42, %v2191_v6  ;;  %4619 = vmatmul.mubr.msk.f32.vlgmr.msra.gmra.mrb[24].mxu1 %vm888_vm1, %v5594_v57 }
 0x30b   : > { %4822 = vmatpush3.bf16.msra.mxu0 %v4819_v44  ;;  %4632 = vmatprep.mubr.msk.f32.mxu1 %vm888_vm1, %v5598_v60 }
 0x30c   : > { %4824 = vmatprep.subr.bf16.mxu1 %v4823_v21  ;;  %4828 = vmatprep.subr.bf16.mxu0 %v5521_v30 }
 0x30d   : > { %4826 = vmatpush3.bf16.msra.mxu1 %v4823_v21 }
 0x30e   : > { %4626 = vmatmul.mubr.msk.f32.vlgmr.msra.gmra.mrb[18].mxu0 %vm888_vm1, %v5605_v52  ;;  %4832 = vmatprep.subr.bf16.mxu1 %v5537_v43 }
 0x30f   : > { %4830 = vmatpush3.bf16.msra.mxu0 %v5521_v30  ;;  %4639 = vmatprep.mubr.msk.f32.mxu0 %vm888_vm1, %v5486_v41  ;;  %v5702_v30 = vld [vmem:[%s5316_s9 + $0x28] sm:$0xff] }
 0x310   : > { %4836 = vmatprep.subr.bf16.mxu0 %v5541_v47  ;;  %4633 = vmatmul.mubr.msk.f32.vlgmr.msra.gmra.mrb[26].mxu1 %vm888_vm1, %v5612_v56 }
 0x311   : > { %4834 = vmatpush3.bf16.msra.mxu1 %v5537_v43  ;;  %4646 = vmatprep.mubr.msk.f32.mxu1 %vm888_vm1, %v5504_v12  ;;  %v834_v43 = vsub.f32 1.0, %v5702_v30 }
 0x312   : > { %4640 = vmatmul.mubr.msk.f32.vlgmr.msra.gmra.mrb[20].mxu0 %vm888_vm1, %v5497_v8 }
 0x313   : > { %4838 = vmatpush3.bf16.msra.mxu0 %v5541_v47  ;;  %4653 = vmatprep.mubr.msk.f32.mxu0 %vm888_vm1, %v5510_v20  ;;  %v843_v47 = vmul.f32 %v5553_v54, %v5702_v30 }
 0x314   : > { %4647 = vmatmul.mubr.msk.f32.vlgmr.msra.gmra.mrb[28].mxu1 %vm888_vm1, %v5517_v27 }
 0x315   : > { %4660 = vmatprep.mubr.msk.f32.mxu1 %vm888_vm1, %v5576_v23  ;;  %v851_v18 = vadd.f32 %v843_v47, %v834_v43 }
 0x316   : > { %4654 = vmatmul.mubr.msk.f32.vlgmr.msra.gmra.mrb[22].mxu0 %vm888_vm1, %v5532_v38 }
 0x317   : > { %4667 = vmatprep.mubr.msk.f32.mxu0 %vm888_vm1, %v5583_v24  ;;  %v867_v58 = vmul.f32 %v859_v13, %v851_v18  ;;  %v910_v61 = vmul.f32 %v902_v48, %v851_v18 }
 0x319   : > { %v885_v63 = vadd.f32 %v877_v33, %v867_v58  ;;  %v926_v0 = vadd.f32 %v918_v53, %v910_v61 }
 0x31b   : > { %894 = vst.msk [vmem:[#allocation2 + $0x28] sm:$0xff] %vm888_vm1, %v885_v63  ;;  %934 = vst.msk [vmem:[#allocation3 + $0x28] sm:$0xff] %vm888_vm1, %v926_v0 }
 0x3dd   : > { %v4620_v22 = vpop.f32.mrb[24].mxu1 }
 0x3de   : > { %v2259_v29 = vpop.f32.mrb[25].mxu1 }
 0x3e1   : > { %v4627_v31 = vpop.f32.mrb[18].mxu0 }
 0x3e2   : > { %v5721_v32 = vsub.f32 %v4620_v22, %v4627_v31  ;;  %v2334_v34 = vpop.f32.mrb[19].mxu0 }
 0x3e3   : > { %v5723_v35 = vsub.f32 %v2259_v29, %v2334_v34  ;;  %v4634_v39 = vpop.f32.mrb[26].mxu1 }
 0x3e4   : > { %v2421_v40 = vsub.f32 %v4634_v39, %v4620_v22  ;;  %v2409_v25 = vpop.f32.mrb[27].mxu1 }
 0x3e5   : > { %v4641_v26 = vpop.f32.mrb[20].mxu0  ;;  %v2420_v37 = vsub.f32 %v2409_v25, %v2259_v29  ;;  %v810_v25 = vld [vmem:[%s5311_s27 + $0x30] sm:$0xff] }
 0x3e6   : > { %v5725_v42 = vsub.f32 %v2421_v40, %v4627_v31  ;;  %v2492_v44 = vpop.f32.mrb[21].mxu0  ;;  %v802_v31 = vld [vmem:[%s5306_s13 + $0x30] sm:$0xff] }
 0x3e7   : > { %v5727_v6 = vsub.f32 %v2420_v37, %v2334_v34  ;;  %v4648_v21 = vpop.f32.mrb[28].mxu1  ;;  %v860_v40 = vld [vmem:[#allocation2 + $0x30] sm:$0xff] }
 0x3e8   : > { %v2652_v43 = vsub.f32 %v4641_v26, %v4648_v21  ;;  %v2567_v47 = vpop.f32.mrb[29].mxu1 }
 0x3e9   : > { %v4655_v13 = vpop.f32.mrb[22].mxu0  ;;  %v2651_v18 = vsub.f32 %v2492_v44, %v2567_v47 }
 0x3ea   : > { %v2658_v33 = vmul.f32 %v2652_v43, %v5702_v30  ;;  %v2654_v48 = vsub.f32 %v4655_v13, %v4641_v26  ;;  %v2642_v53 = vpop.f32.mrb[23].mxu0  ;;  %v903_v26 = vld [vmem:[#allocation3 + $0x30] sm:$0xff] }
 0x3eb   : > { %v2657_v58 = vmul.f32 %v2651_v18, %v792_v62  ;;  %v2653_v61 = vsub.f32 %v2642_v53, %v2492_v44  ;;  %v878_v44 = vmul.f32 %v5559_v59, %v802_v31 }
 0x3ec   : > { %v2660_v63 = vsub.f32 %v801_v10, %v2658_v33  ;;  %v2656_v0 = vsub.f32 %v2654_v48, %v4648_v21  ;;  %v919_v21 = vmul.f32 %v5559_v59, %v810_v25 }
 0x3ed   : > { %v2659_v5 = vsub.f32 %v800_v3, %v2657_v58  ;;  %v2655_v2 = vsub.f32 %v2653_v61, %v2567_v47 }
 0x3ee   : > { %v2664_v28 = vmul.f32 %v2656_v0, %v5702_v30  ;;  %v2662_v7 = vmul.f32 %v2660_v63, %v5702_v30 }
 0x3ef   : > { %v2663_v9 = vmul.f32 %v2655_v2, %v792_v62  ;;  %v2661_v11 = vmul.f32 %v2659_v5, %v792_v62 }
 0x3f0   : > { %v2666_v14 = vsub.f32 %v809_v46, %v2664_v28  ;;  %v794_v46 = vld [vmem:[%s5316_s9 + $0x30] sm:$0xff] }
 0x3f1   : > { %v2665_v15 = vsub.f32 %v808_v36, %v2663_v9  ;;  %v4839_v16 = vpack.c.bf16 %v2662_v7, %v2661_v11  ;;  %v835_v34 = vsub.f32 1.0, %v794_v46  ;;  %v844_v39 = vmul.f32 %v5553_v54, %v794_v46 }
 0x3f2   : > { %v2668_v17 = vmul.f32 %v2666_v14, %v5702_v30 }
 0x3f3   : > { %4840 = vmatprep.subr.bf16.mxu1 %v4839_v16  ;;  %v2667_v19 = vmul.f32 %v2665_v15, %v792_v62  ;;  %v852_v37 = vadd.f32 %v844_v39, %v835_v34 }
 0x3f4   : > { %4842 = vmatpush3.bf16.msra.mxu1 %v4839_v16  ;;  %v2670_v22 = vadd.f32 %v2668_v17, %v2662_v7 }
 0x3f5   : > { %v4843_v29 = vpack.c.bf16 %v2668_v17, %v2667_v19  ;;  %v2669_v10 = vadd.f32 %v2667_v19, %v2661_v11  ;;  %v868_v43 = vmul.f32 %v860_v40, %v852_v37  ;;  %v911_v47 = vmul.f32 %v903_v26, %v852_v37 }
 0x3f7   : > { %4844 = vmatprep.subr.bf16.mxu0 %v4843_v29  ;;  %v4847_v3 = vpack.c.bf16 %v2670_v22, %v2669_v10  ;;  %4661 = vmatmul.mubr.msk.f32.vlgmr.msra.gmra.mrb[30].mxu1 %vm888_vm1, %v5594_v57  ;;  %v886_v13 = vadd.f32 %v878_v44, %v868_v43  ;;  %v927_v18 = vadd.f32 %v919_v21, %v911_v47 }
 0x3f8   : > { %4846 = vmatpush3.bf16.msra.mxu0 %v4843_v29  ;;  %4674 = vmatprep.mubr.msk.f32.mxu1 %vm888_vm1, %v5598_v60 }
 0x3f9   : > { %4848 = vmatprep.subr.bf16.mxu1 %v4847_v3  ;;  %4852 = vmatprep.subr.bf16.mxu0 %v5539_v45  ;;  %895 = vst.msk [vmem:[#allocation2 + $0x30] sm:$0xff] %vm888_vm1, %v886_v13  ;;  %935 = vst.msk [vmem:[#allocation3 + $0x30] sm:$0xff] %vm888_vm1, %v927_v18 }
 0x3fa   : > { %4850 = vmatpush3.bf16.msra.mxu1 %v4847_v3 }
 0x3fb   : > { %4668 = vmatmul.mubr.msk.f32.vlgmr.msra.gmra.mrb[24].mxu0 %vm888_vm1, %v5605_v52  ;;  %4856 = vmatprep.subr.bf16.mxu1 %v5545_v50 }
 0x3fc   : > { %4854 = vmatpush3.bf16.msra.mxu0 %v5539_v45  ;;  %4681 = vmatprep.mubr.msk.f32.mxu0 %vm888_vm1, %v5486_v41  ;;  %v5764_v41 = vld [vmem:[%s5316_s9 + $0x38] sm:$0xff] }
 0x3fd   : > { %4860 = vmatprep.subr.bf16.mxu0 %v5547_v51  ;;  %4675 = vmatmul.mubr.msk.f32.vlgmr.msra.gmra.mrb[32].mxu1 %vm888_vm1, %v5612_v56 }
 0x3fe   : > { %4858 = vmatpush3.bf16.msra.mxu1 %v5545_v50  ;;  %4688 = vmatprep.mubr.msk.f32.mxu1 %vm888_vm1, %v5504_v12  ;;  %v845_v12 = vmul.f32 %v5553_v54, %v5764_v41 }
 0x3ff   : > { %4682 = vmatmul.mubr.msk.f32.vlgmr.msra.gmra.mrb[26].mxu0 %vm888_vm1, %v5497_v8  ;;  %v836_v8 = vsub.f32 1.0, %v5764_v41 }
 0x400   : > { %4862 = vmatpush3.bf16.msra.mxu0 %v5547_v51  ;;  %4695 = vmatprep.mubr.msk.f32.mxu0 %vm888_vm1, %v5510_v20  ;;  %v803_v20 = vld [vmem:[%s5306_s13 + $0x38] sm:$0xff] }
 0x401   : > { %4689 = vmatmul.mubr.msk.f32.vlgmr.msra.gmra.mrb[34].mxu1 %vm888_vm1, %v5517_v27  ;;  %v861_v27 = vld [vmem:[#allocation2 + $0x38] sm:$0xff]  ;;  %v853_v45 = vadd.f32 %v845_v12, %v836_v8  ;;  %v879_v50 = vmul.f32 %v5559_v59, %v803_v20 }
 0x402   : > { %4702 = vmatprep.mubr.msk.f32.mxu1 %vm888_vm1, %v5576_v23  ;;  %v5772_v51 = vld [vmem:[%s5311_s27 + $0x38] sm:$0xff]  ;;  %s6178_s27 = sld [smem:[#allocation35_spill]] }
 0x403   : > { %4696 = vmatmul.mubr.msk.f32.vlgmr.msra.gmra.mrb[28].mxu0 %vm888_vm1, %v5532_v38  ;;  %v904_v38 = vld [vmem:[#allocation3 + $0x38] sm:$0xff]  ;;  %v920_v23 = vmul.f32 %v5559_v59, %v5772_v51 }
 0x404   : > { %4709 = vmatprep.mubr.msk.f32.mxu0 %vm888_vm1, %v5583_v24  ;;  %v869_v24 = vmul.f32 %v861_v27, %v853_v45  ;;  %v912_v30 = vmul.f32 %v904_v38, %v853_v45 }
 0x406   : > { %v887_v62 = vadd.f32 %v879_v50, %v869_v24  ;;  %v928_v36 = vadd.f32 %v920_v23, %v912_v30 }
 0x408   : > { %896 = vst.msk [vmem:[#allocation2 + $0x38] sm:$0xff] %vm888_vm1, %v887_v62  ;;  %936 = vst.msk [vmem:[#allocation3 + $0x38] sm:$0xff] %vm888_vm1, %v928_v36  ;;  %v1001_v26 = vld [vmem:[%s6178_s27] sm:$0xff] }
 0x4ca   : > { %v4662_v54 = vpop.f32.mrb[30].mxu1 }
 0x4cb   : > { %v2737_v33 = vpop.f32.mrb[31].mxu1 }
 0x4ce   : > { %v4669_v48 = vpop.f32.mrb[24].mxu0 }
 0x4cf   : > { %v5786_v53 = vsub.f32 %v4662_v54, %v4669_v48  ;;  %v2812_v58 = vpop.f32.mrb[25].mxu0 }
 0x4d0   : > { %v5788_v61 = vsub.f32 %v2737_v33, %v2812_v58  ;;  %v4676_v63 = vpop.f32.mrb[32].mxu1 }
 0x4d1   : > { %v2899_v0 = vsub.f32 %v4676_v63, %v4662_v54  ;;  %v2887_v5 = vpop.f32.mrb[33].mxu1 }
 0x4d2   : > { %v4683_v59 = vpop.f32.mrb[26].mxu0  ;;  %v2898_v2 = vsub.f32 %v2887_v5, %v2737_v33 }
 0x4d3   : > { %v5790_v28 = vsub.f32 %v2899_v0, %v4669_v48  ;;  %v2970_v7 = vpop.f32.mrb[27].mxu0 }
 0x4d4   : > { %v2900_v9 = vsub.f32 %v2898_v2, %v2812_v58  ;;  %v4690_v11 = vpop.f32.mrb[34].mxu1 }
 0x4d5   : > { %v5794_v14 = vadd.f32 %v5790_v28, %v5786_v53  ;;  %v3130_v15 = vsub.f32 %v4683_v59, %v4690_v11  ;;  %v3045_v16 = vpop.f32.mrb[35].mxu1 }
 0x4d6   : > { %v5797_v17 = vadd.f32 %v2900_v9, %v5788_v61  ;;  %v4697_v19 = vpop.f32.mrb[28].mxu0  ;;  %v3129_v22 = vsub.f32 %v2970_v7, %v3045_v16 }
 0x4d7   : > { %v3136_v29 = vmul.f32 %v3130_v15, %v5764_v41  ;;  %v3132_v10 = vsub.f32 %v4697_v19, %v4683_v59  ;;  %v3120_v3 = vpop.f32.mrb[29].mxu0 }
 0x4d8   : > { %v3135_v8 = vmul.f32 %v3129_v22, %v794_v46  ;;  %v3131_v12 = vsub.f32 %v3120_v3, %v2970_v7  ;;  %v3381_v7 = vadd.f32 %v5663_v1, %v5659_v49 }
 0x4d9   : > { %v3138_v27 = vsub.f32 %v803_v20, %v3136_v29  ;;  %v3134_v45 = vsub.f32 %v3132_v10, %v4690_v11  ;;  %v1002_v20 = vld [vmem:[%s6178_s27 + $0x8] sm:$0xff] }
 0x4da   : > { %v3137_v50 = vsub.f32 %v802_v31, %v3135_v8  ;;  %v3133_v38 = vsub.f32 %v3131_v12, %v3045_v16  ;;  %v4875_v21 = vpack.c.bf16 %v1002_v20, %v1001_v26 }
 0x4db   : > { %v3142_v23 = vmul.f32 %v3134_v45, %v5764_v41  ;;  %v3140_v24 = vmul.f32 %v3138_v27, %v5764_v41 }
 0x4dc   : > { %v3141_v30 = vmul.f32 %v3133_v38, %v794_v46  ;;  %v3139_v62 = vmul.f32 %v3137_v50, %v794_v46 }
 0x4dd   : > { %v3144_v36 = vsub.f32 %v5772_v51, %v3142_v23  ;;  %v1003_v51 = vld [vmem:[%s6179_s3] sm:$0xff] }
 0x4de   : > { %v3143_v34 = vsub.f32 %v810_v25, %v3141_v30  ;;  %v4863_v39 = vpack.c.bf16 %v3140_v24, %v3139_v62 }
 0x4df   : > { %v3146_v40 = vmul.f32 %v3144_v36, %v5764_v41  ;;  %v1004_v41 = vld [vmem:[%s6180_s0 + $0x8] sm:$0xff] }
 0x4e0   : > { %4864 = vmatprep.subr.bf16.mxu1 %v4863_v39  ;;  %v3145_v31 = vmul.f32 %v3143_v34, %v794_v46  ;;  %v4879_v47 = vpack.c.bf16 %v1004_v41, %v1003_v51  ;;  %v4967_v36 = vld [vmem:[%s5321_s25 + $0x8] sm:$0xff] }
 0x4e1   : > { %4866 = vmatpush3.bf16.msra.mxu1 %v4863_v39  ;;  %v3148_v37 = vadd.f32 %v3146_v40, %v3140_v24  ;;  %v4968_v39 = vld [vmem:[%s5326_s14 + $0x8] sm:$0xff] }
 0x4e2   : > { %v4867_v25 = vpack.c.bf16 %v3146_v40, %v3145_v31  ;;  %v3147_v44 = vadd.f32 %v3145_v31, %v3139_v62 }
 0x4e4   : > { %4868 = vmatprep.subr.bf16.mxu0 %v4867_v25  ;;  %4703 = vmatmul.mubr.msk.f32.vlgmr.msra.gmra.mrb[36].mxu1 %vm888_vm1, %v5594_v57  ;;  %v4871_v43 = vpack.c.bf16 %v3148_v37, %v3147_v44  ;;  %v1011_v57 = vadd.f32 %v1003_v51, %v1001_v26  ;;  %v4969_v26 = vld [vmem:[%s5321_s25] sm:$0xff]  ;;  %v4972_v44 = vld [vmem:[%s5326_s14 + $0x18] sm:$0xff] }
 0x4e5   : > { %4870 = vmatpush3.bf16.msra.mxu0 %v4867_v25  ;;  %4716 = vmatprep.mubr.msk.f32.mxu1 %vm888_vm1, %v5598_v60  ;;  %v1012_v60 = vadd.f32 %v1004_v41, %v1002_v20  ;;  %v4970_v37 = vld [vmem:[%s5326_s14] sm:$0xff]  ;;  %v4971_v41 = vld [vmem:[%s5321_s25 + $0x18] sm:$0xff] }
 0x4e6   : > { %4872 = vmatprep.subr.bf16.mxu1 %v4871_v43  ;;  %4876 = vmatprep.subr.bf16.mxu0 %v4875_v21 }
 0x4e7   : > { %4874 = vmatpush3.bf16.msra.mxu1 %v4871_v43 }
 0x4e8   : > { %4710 = vmatmul.mubr.msk.f32.vlgmr.msra.gmra.mrb[30].mxu0 %vm888_vm1, %v5605_v52  ;;  %4880 = vmatprep.subr.bf16.mxu1 %v4879_v47  ;;  %v4883_v52 = vpack.c.bf16 %v1012_v60, %v1011_v57  ;;  %v4973_v57 = vld [vmem:[%s5321_s25 + $0x10] sm:$0xff] }
 0x4e9   : > { %4878 = vmatpush3.bf16.msra.mxu0 %v4875_v21  ;;  %4723 = vmatprep.mubr.msk.f32.mxu0 %vm888_vm1, %v5661_v55 }
 0x4ea   : > { %4717 = vmatmul.mubr.msk.f32.vlgmr.msra.gmra.mrb[38].mxu1 %vm888_vm1, %v5612_v56  ;;  %4884 = vmatprep.subr.bf16.mxu0 %v4883_v52 }
 0x4eb   : > { %4882 = vmatpush3.bf16.msra.mxu1 %v4879_v47  ;;  %4739 = vmatprep.mubr.msk.f32.mxu1 %vm888_vm1, %v5665_v4 }
 0x4ec   : > { %4724 = vmatmul.mubr.msk.f32.vlgmr.msra.gmra.mrb[32].mxu0 %vm888_vm1, %v5659_v49  ;;  %v3383_v49 = vadd.f32 %v5725_v42, %v5721_v32 }
 0x4ed   : > { %4726 = vmatprep.mubr.msk.f32.mxu0 %vm888_vm1, %v5723_v35  ;;  %4886 = vmatpush3.bf16.msra.mxu0 %v4883_v52 }
 0x4ee   : > { %4740 = vmatmul.mubr.msk.f32.vlgmr.msra.gmra.mrb[40].mxu1 %vm888_vm1, %v5663_v1 }
 0x4ef   : > { %4742 = vmatprep.mubr.msk.f32.mxu1 %vm888_vm1, %v5727_v6 }
 0x4f0   : > { %4727 = vmatmul.mubr.msk.f32.gmra.mrb[34].mxu0 %vm888_vm1, %v5721_v32 }
 0x4f1   : > { %4729 = vmatprep.mubr.msk.f32.mxu0 %vm888_vm1, %v5788_v61 }
 0x4f2   : > { %4743 = vmatmul.mubr.msk.f32.gmra.mrb[42].mxu1 %vm888_vm1, %v5725_v42 }
 0x4f3   : > { %4745 = vmatprep.mubr.msk.f32.mxu1 %vm888_vm1, %v2900_v9 }
 0x4f4   : > { %4730 = vmatmul.mubr.msk.f32.gmra.mrb[36].mxu0 %vm888_vm1, %v5786_v53  ;;  %v3380_v53 = vadd.f32 %v5665_v4, %v5661_v55  ;;  %v3382_v55 = vadd.f32 %v5727_v6, %v5723_v35 }
 0x4f6   : > { %4746 = vmatmul.mubr.msk.f32.gmra.mrb[44].mxu1 %vm888_vm1, %v5790_v28 }
 0x5b7   : > { %v4704_v56 = vpop.f32.mrb[36].mxu1 }
 0x5b8   : > { %v3215_v46 = vpop.f32.mrb[37].mxu1 }
 0x5bb   : > { %v4711_v13 = vpop.f32.mrb[30].mxu0 }
 0x5bc   : > { %v3375_v18 = vsub.f32 %v4704_v56, %v4711_v13  ;;  %v3290_v54 = vpop.f32.mrb[31].mxu0 }
 0x5bd   : > { %v3374_v33 = vsub.f32 %v3215_v46, %v3290_v54  ;;  %v4718_v48 = vpop.f32.mrb[38].mxu1 }
 0x5be   : > { %v3377_v58 = vsub.f32 %v4718_v48, %v4704_v56  ;;  %v3365_v61 = vpop.f32.mrb[39].mxu1 }
 0x5bf   : > { %v4725_v63 = vpop.f32.mrb[32].mxu0  ;;  %4732 = vmatprep.mubr.msk.f32.mxu0 %vm888_vm1, %v3374_v33  ;;  %v3376_v0 = vsub.f32 %v3365_v61, %v3215_v46  ;;  %v4975_v61 = vld [vmem:[%s5321_s25 + $0x28] sm:$0xff] }
 0x5c0   : > { %v3379_v5 = vsub.f32 %v3377_v58, %v4711_v13  ;;  %v3478_v59 = vpop.f32.mrb[33].mxu0  ;;  %4733 = vmatmul.mubr.msk.f32.gmra.mrb[38].mxu0 %vm888_vm1, %v3375_v18 }
 0x5c1   : > { %v3378_v2 = vsub.f32 %v3376_v0, %v3290_v54  ;;  %v4741_v28 = vpop.f32.mrb[40].mxu1  ;;  %4755 = vmatprep.mubr.msk.f32.mxu0 %vm888_vm1, %v3380_v53 }
 0x5c2   : > { %v3387_v9 = vadd.f32 %v3379_v5, %v3375_v18  ;;  %v3776_v11 = vsub.f32 %v4725_v63, %v4741_v28  ;;  %v3607_v15 = vpop.f32.mrb[41].mxu1  ;;  %v4974_v18 = vld [vmem:[%s5326_s14 + $0x10] sm:$0xff] }
 0x5c3   : > { %v3386_v4 = vadd.f32 %v3378_v2, %v3374_v33  ;;  %v3775_v16 = vsub.f32 %v3478_v59, %v3607_v15  ;;  %v5856_v19 = vpop.f32.mrb[34].mxu0  ;;  %4748 = vmatprep.mubr.msk.f32.mxu1 %vm888_vm1, %v3378_v2 }
 0x5c4   : > { %v5859_v22 = vpop.f32.mrb[35].mxu0  ;;  %4756 = vmatmul.mubr.msk.f32.vlgmr.msra.gmra.mrb[40].mxu0 %vm888_vm1, %v3381_v7  ;;  %4749 = vmatmul.mubr.msk.f32.gmra.mrb[46].mxu1 %vm888_vm1, %v3379_v5  ;;  %v3800_v34 = vmul.f32 %v4967_v36, %v3776_v11  ;;  %v3850_v40 = vmul.f32 %v4968_v39, %v3776_v11 }
 0x5c5   : > { %v4744_v29 = vpop.f32.mrb[42].mxu1  ;;  %4758 = vmatprep.mubr.msk.f32.mxu0 %vm888_vm1, %v3382_v55  ;;  %v3799_v20 = vmul.f32 %v4969_v26, %v3775_v16  ;;  %v3849_v51 = vmul.f32 %v4970_v37, %v3775_v16 }
 0x5c6   : > { %v3778_v1 = vsub.f32 %v5856_v19, %v4744_v29  ;;  %v3617_v35 = vpop.f32.mrb[43].mxu1 }
 0x5c7   : > { %v3777_v6 = vsub.f32 %v5859_v22, %v3617_v35  ;;  %v5868_v10 = vpop.f32.mrb[36].mxu0 }
 0x5c8   : > { %v5870_v3 = vpop.f32.mrb[37].mxu0  ;;  %4759 = vmatmul.mubr.msk.f32.gmra.mrb[42].mxu0 %vm888_vm1, %v3383_v49  ;;  %v3802_v25 = vmul.f32 %v4971_v41, %v3778_v1  ;;  %v3852_v21 = vmul.f32 %v4972_v44, %v3778_v1 }
 0x5c9   : > { %v5873_v8 = vpop.f32.mrb[44].mxu1  ;;  %4761 = vmatprep.mubr.msk.f32.mxu0 %vm888_vm1, %v5797_v17  ;;  %v3801_v60 = vmul.f32 %v4973_v57, %v3777_v6  ;;  %v3851_v54 = vmul.f32 %v4974_v18, %v3777_v6 }
 0x5ca   : > { %v3780_v12 = vsub.f32 %v5868_v10, %v5873_v8  ;;  %v5879_v32 = vpop.f32.mrb[45].mxu1 }
 0x5cb   : > { %v3779_v42 = vsub.f32 %v5870_v3, %v5879_v32 }
 0x5cc   : > { %4762 = vmatmul.mubr.msk.f32.gmra.mrb[44].mxu0 %vm888_vm1, %v5794_v14  ;;  %v3804_v53 = vmul.f32 %v4975_v61, %v3780_v12 }
 0x5cd   : > { %4764 = vmatprep.mubr.msk.f32.mxu0 %vm888_vm1, %v3386_v4  ;;  %v4978_v4 = vld [vmem:[%s5326_s14 + $0x20] sm:$0xff] }
 0x5ce   : > { %v3853_v16 = vmul.f32 %v4978_v4, %v3779_v42 }
 0x5d0   : > { %4765 = vmatmul.mubr.msk.f32.gmra.mrb[46].mxu0 %vm888_vm1, %v3387_v9 }
 0x693   : > { %v5887_v27 = vpop.f32.mrb[38].mxu0 }
 0x694   : > { %v5889_v17 = vpop.f32.mrb[39].mxu0 }
 0x697   : > { %v4757_v45 = vpop.f32.mrb[40].mxu0  ;;  %v5891_v50 = vpop.f32.mrb[46].mxu1 }
 0x698   : > { %v3784_v38 = vsub.f32 %v4757_v45, %v4725_v63  ;;  %v3736_v23 = vpop.f32.mrb[41].mxu0  ;;  %v5895_v14 = vsub.f32 %v5887_v27, %v5891_v50  ;;  %v5897_v24 = vpop.f32.mrb[47].mxu1 }
 0x699   : > { %v3783_v30 = vsub.f32 %v3736_v23, %v3478_v59  ;;  %v5901_v62 = vsub.f32 %v5889_v17, %v5897_v24  ;;  %v4976_v59 = vld [vmem:[%s5326_s14 + $0x28] sm:$0xff] }
 0x69a   : > { %v3792_v31 = vsub.f32 %v3784_v38, %v4741_v28  ;;  %v3854_v2 = vmul.f32 %v4976_v59, %v3780_v12 }
 0x69b   : > { %v3791_v43 = vsub.f32 %v3783_v30, %v3607_v15  ;;  %v4760_v47 = vpop.f32.mrb[42].mxu0  ;;  %v4977_v15 = vld [vmem:[%s5321_s25 + $0x20] sm:$0xff] }
 0x69c   : > { %v3808_v52 = vmul.f32 %v4968_v39, %v3792_v31  ;;  %v3842_v56 = vmul.f32 %v4967_v36, %v3792_v31  ;;  %v3786_v46 = vsub.f32 %v4760_v47, %v5856_v19  ;;  %v3746_v13 = vpop.f32.mrb[43].mxu0  ;;  %v3803_v55 = vmul.f32 %v4977_v15, %v3779_v42 }
 0x69d   : > { %v3807_v33 = vmul.f32 %v4970_v37, %v3791_v43  ;;  %v3841_v48 = vmul.f32 %v4969_v26, %v3791_v43  ;;  %v3785_v58 = vsub.f32 %v3746_v13, %v5859_v22 }
 0x69e   : > { %v3816_v63 = vadd.f32 %v3808_v52, %v3800_v34  ;;  %v3858_v0 = vsub.f32 %v3842_v56, %v3850_v40  ;;  %v3794_v5 = vsub.f32 %v3786_v46, %v4744_v29 }
 0x69f   : > { %v3815_v28 = vadd.f32 %v3807_v33, %v3799_v20  ;;  %v3857_v7 = vsub.f32 %v3841_v48, %v3849_v51  ;;  %v3793_v9 = vsub.f32 %v3785_v58, %v3617_v35  ;;  %v4763_v11 = vpop.f32.mrb[44].mxu0  ;;  %v4980_v48 = vld [vmem:[%s5326_s14 + $0x38] sm:$0xff] }
 0x6a0   : > { %v3810_v19 = vmul.f32 %v4972_v44, %v3794_v5  ;;  %v3844_v49 = vmul.f32 %v4971_v41, %v3794_v5  ;;  %v3756_v1 = vpop.f32.mrb[45].mxu0  ;;  %v3830_v22 = vsel %vm888_vm1, %v3816_v63, 0.0  ;;  %v3872_v6 = vsel %vm888_vm1, %v3858_v0, 0.0 }
 0x6a1   : > { %v3809_v45 = vmul.f32 %v4974_v18, %v3793_v9  ;;  %v3843_v38 = vmul.f32 %v4973_v57, %v3793_v9  ;;  %v3788_v12 = vsub.f32 %v4763_v11, %v5868_v10  ;;  %v3787_v35 = vsub.f32 %v3756_v1, %v5870_v3 }
 0x6a2   : > { %v3818_v29 = vadd.f32 %v3810_v19, %v3802_v25  ;;  %v3860_v23 = vsub.f32 %v3844_v49, %v3852_v21  ;;  %v3823_v30 = vsel %vm888_vm1, %v3815_v28, 0.0  ;;  %v3865_v36 = vsel %vm888_vm1, %v3857_v7, 0.0  ;;  %v4982_v7 = vld [vmem:[%s5326_s14 + $0x30] sm:$0xff] }
 0x6a3   : > { %v3817_v42 = vadd.f32 %v3809_v45, %v3801_v60  ;;  %v3859_v34 = vsub.f32 %v3843_v38, %v3851_v54  ;;  %v4766_v39 = vpop.f32.mrb[46].mxu0  ;;  %v3796_v20 = vsub.f32 %v3788_v12, %v5873_v8  ;;  %v3795_v31 = vsub.f32 %v3787_v35, %v5879_v32  ;;  %v4979_v54 = vld [vmem:[%s5321_s25 + $0x38] sm:$0xff] }
 0x6a4   : > { %v3831_v40 = vsel %vm888_vm1, %v3818_v29, 0.0  ;;  %v3873_v26 = vsel %vm888_vm1, %v3860_v23, 0.0  ;;  %v3766_v37 = vpop.f32.mrb[47].mxu0  ;;  %v3790_v60 = vsub.f32 %v4766_v39, %v5887_v27  ;;  %v3806_v33 = vmul.f32 %v4979_v54, %v5895_v14  ;;  %v4983_v23 = vld [vmem:[#allocation4 + $0x8] sm:$0xff]  ;;  %v4984_v12 = vld [vmem:[#allocation5 + $0x8] sm:$0xff]  ;;  %v3887_v39 = vld [vmem:[#allocation2] sm:$0xff] (!%p4327_p0) }
 0x6a5   : > { %v3832_v51 = vadd.f32 %v3831_v40, %v3830_v22  ;;  %v3874_v10 = vadd.f32 %v3873_v26, %v3872_v6  ;;  %v3824_v3 = vsel %vm888_vm1, %v3817_v42, 0.0  ;;  %v3866_v41 = vsel %vm888_vm1, %v3859_v34, 0.0  ;;  %v4986_v42 = vld [vmem:[#allocation5] sm:$0xff]  ;;  %v3888_v40 = vld [vmem:[#allocation2 + $0x8] sm:$0xff] (!%p4327_p0)  ;;  %3895 = vst.msk [vmem:[%s5338_s21] sm:$0xff] (!%p4327_p0), %vm888_vm1, %v3887_v39 }
 0x6a6   : > { %v3825_v25 = vadd.f32 %v3824_v3, %v3823_v30  ;;  %v3867_v44 = vadd.f32 %v3866_v41, %v3865_v36  ;;  %v3812_v21 = vmul.f32 %v4976_v59, %v3796_v20  ;;  %v3846_v43 = vmul.f32 %v4975_v61, %v3796_v20  ;;  %v4985_v30 = vld [vmem:[#allocation4] sm:$0xff]  ;;  %v3889_v26 = vld [vmem:[#allocation2 + $0x10] sm:$0xff] (!%p4327_p0)  ;;  %3896 = vst.msk [vmem:[%s5338_s21 + $0x8] sm:$0xff] (!%p4327_p0), %vm888_vm1, %v3888_v40  ;;  %v3890_v20 = vld [vmem:[#allocation2 + $0x18] sm:$0xff] (!%p4327_p0) }
 0x6a7   : > { %v3811_v47 = vmul.f32 %v4978_v4, %v3795_v31  ;;  %v3845_v57 = vmul.f32 %v4977_v15, %v3795_v31  ;;  %v3789_v8 = vsub.f32 %v3766_v37, %v5889_v17  ;;  %v3798_v13 = vsub.f32 %v3790_v60, %v5891_v50  ;;  %3897 = vst.msk [vmem:[%s5338_s21 + $0x10] sm:$0xff] (!%p4327_p0), %vm888_vm1, %v3889_v26  ;;  %v3891_v31 = vld [vmem:[#allocation2 + $0x20] sm:$0xff] (!%p4327_p0)  ;;  %v3892_v37 = vld [vmem:[#allocation2 + $0x28] sm:$0xff] (!%p4327_p0) }
 0x6a8   : > { %v3820_v32 = vadd.f32 %v3812_v21, %v3804_v53  ;;  %v3862_v52 = vsub.f32 %v3846_v43, %v3854_v2  ;;  %v3856_v58 = vmul.f32 %v4980_v48, %v5895_v14  ;;  %v4981_v2 = vld [vmem:[%s5321_s25 + $0x30] sm:$0xff]  ;;  %v3855_v14 = vmul.f32 %v4982_v7, %v5901_v62  ;;  %3898 = vst.msk [vmem:[%s5338_s21 + $0x18] sm:$0xff] (!%p4327_p0), %vm888_vm1, %v3890_v20  ;;  %v3903_v3 = vld [vmem:[#allocation3] sm:$0xff] (!%p4327_p0)  ;;  %v3904_v41 = vld [vmem:[#allocation3 + $0x8] sm:$0xff] (!%p4327_p0) }
 0x6a9   : > { %v3819_v56 = vadd.f32 %v3811_v47, %v3803_v55  ;;  %v3861_v46 = vsub.f32 %v3845_v57, %v3853_v16  ;;  %v3797_v18 = vsub.f32 %v3789_v8, %v5897_v24  ;;  %v3814_v24 = vmul.f32 %v4980_v48, %v3798_v13  ;;  %3899 = vst.msk [vmem:[%s5338_s21 + $0x20] sm:$0xff] (!%p4327_p0), %vm888_vm1, %v3891_v31  ;;  %v3907_v21 = vld [vmem:[#allocation3 + $0x20] sm:$0xff] (!%p4327_p0)  ;;  %v3908_v43 = vld [vmem:[#allocation3 + $0x28] sm:$0xff] (!%p4327_p0)  ;;  %v3909_v47 = vld [vmem:[#allocation3 + $0x30] sm:$0xff] (!%p4327_p0) }
 0x6aa   : > { %v3833_v27 = vsel %vm888_vm1, %v3820_v32, 0.0  ;;  %v3875_v17 = vsel %vm888_vm1, %v3862_v52, 0.0  ;;  %v3848_v59 = vmul.f32 %v4979_v54, %v3798_v13  ;;  %v3805_v28 = vmul.f32 %v4981_v2, %v5901_v62  ;;  %3900 = vst.msk [vmem:[%s5338_s21 + $0x28] sm:$0xff] (!%p4327_p0), %vm888_vm1, %v3892_v37  ;;  %3911 = vst.msk [vmem:[%s5340_s16] sm:$0xff] (!%p4327_p0), %vm888_vm1, %v3903_v3  ;;  %v3910_v57 = vld [vmem:[#allocation3 + $0x38] sm:$0xff] (!%p4327_p0) }
 0x6ab   : > { %v3834_v61 = vadd.f32 %v3833_v27, %v3832_v51  ;;  %v3876_v53 = vadd.f32 %v3875_v17, %v3874_v10  ;;  %v3826_v63 = vsel %vm888_vm1, %v3819_v56, 0.0  ;;  %v3868_v50 = vsel %vm888_vm1, %v3861_v46, 0.0  ;;  %v3893_v51 = vld [vmem:[#allocation2 + $0x30] sm:$0xff] (!%p4327_p0)  ;;  %v3894_v10 = vld [vmem:[#allocation2 + $0x38] sm:$0xff] (!%p4327_p0)  ;;  %3912 = vst.msk [vmem:[%s5340_s16 + $0x8] sm:$0xff] (!%p4327_p0), %vm888_vm1, %v3904_v41  ;;  %3915 = vst.msk [vmem:[%s5340_s16 + $0x20] sm:$0xff] (!%p4327_p0), %vm888_vm1, %v3907_v21 }
 0x6ac   : > { %v3827_v0 = vadd.f32 %v3826_v63, %v3825_v25  ;;  %v3869_v5 = vadd.f32 %v3868_v50, %v3867_v44  ;;  %v3813_v9 = vmul.f32 %v4982_v7, %v3797_v18  ;;  %v3847_v11 = vmul.f32 %v4981_v2, %v3797_v18  ;;  %3901 = vst.msk [vmem:[%s5338_s21 + $0x30] sm:$0xff] (!%p4327_p0), %vm888_vm1, %v3893_v51  ;;  %v3905_v25 = vld [vmem:[#allocation3 + $0x10] sm:$0xff] (!%p4327_p0)  ;;  %v3906_v44 = vld [vmem:[#allocation3 + $0x18] sm:$0xff] (!%p4327_p0) }
 0x6ad   : > { %v3822_v15 = vadd.f32 %v3814_v24, %v3806_v33  ;;  %v3864_v55 = vsub.f32 %v3848_v59, %v3856_v58  ;;  %3902 = vst.msk [vmem:[%s5338_s21 + $0x38] sm:$0xff] (!%p4327_p0), %vm888_vm1, %v3894_v10  ;;  %3913 = vst.msk [vmem:[%s5340_s16 + $0x10] sm:$0xff] (!%p4327_p0), %vm888_vm1, %v3905_v25 }
 0x6ae   : > { %v3821_v4 = vadd.f32 %v3813_v9, %v3805_v28  ;;  %v3863_v16 = vsub.f32 %v3847_v11, %v3855_v14  ;;  %3914 = vst.msk [vmem:[%s5340_s16 + $0x18] sm:$0xff] (!%p4327_p0), %vm888_vm1, %v3906_v44  ;;  %3916 = vst.msk [vmem:[%s5340_s16 + $0x28] sm:$0xff] (!%p4327_p0), %vm888_vm1, %v3908_v43 }
 0x6af   : > { %v3835_v19 = vsel %vm888_vm1, %v3822_v15, 0.0  ;;  %v3877_v49 = vsel %vm888_vm1, %v3864_v55, 0.0  ;;  %3886 = sbr.rel (%p4327_p0) target bundleno = 1726 (0x6be), region = 88  ;;  %3917 = vst.msk [vmem:[%s5340_s16 + $0x30] sm:$0xff] (!%p4327_p0), %vm888_vm1, %v3909_v47  ;;  %3918 = vst.msk [vmem:[%s5340_s16 + $0x38] sm:$0xff] (!%p4327_p0), %vm888_vm1, %v3910_v57 }
 0x6b0   : > { %v3836_v1 = vadd.f32 %v3835_v19, %v3834_v61  ;;  %v3878_v22 = vadd.f32 %v3877_v49, %v3876_v53  ;;  %v3828_v6 = vsel %vm888_vm1, %v3821_v4, 0.0  ;;  %v3870_v45 = vsel %vm888_vm1, %v3863_v16, 0.0 }
 0x6b1   : > { %v3829_v38 = vadd.f32 %v3828_v6, %v3827_v0  ;;  %v3871_v29 = vadd.f32 %v3870_v45, %v3869_v5 }
 0x6b2   : > { %v3838_v62 = vadd.f32 %v4983_v23, %v3836_v1  ;;  %v3880_v35 = vadd.f32 %v4984_v12, %v3878_v22 }
 0x6b3   : > { %v3837_v36 = vadd.f32 %v4985_v30, %v3829_v38  ;;  %v3879_v34 = vadd.f32 %v4986_v42, %v3871_v29 }
 0x6b4   : > { %3840 = vst.msk [vmem:[#allocation4 + $0x8] sm:$0xff] %vm888_vm1, %v3838_v62  ;;  %3882 = vst.msk [vmem:[#allocation5 + $0x8] sm:$0xff] %vm888_vm1, %v3880_v35 }
 0x6b5   : > { %3839 = vst.msk [vmem:[#allocation4] sm:$0xff] %vm888_vm1, %v3837_v36  ;;  %3881 = vst.msk [vmem:[#allocation5] sm:$0xff] %vm888_vm1, %v3879_v34 }
 0x6bb   : > { %v3920_v8 = vld [vmem:[#allocation4 + $0x8] sm:$0xff]  ;;  %v3924_v52 = vld [vmem:[#allocation5 + $0x8] sm:$0xff] }
 0x6bc   : > { %v3919_v60 = vld [vmem:[#allocation4] sm:$0xff]  ;;  %3922 = vst.msk [vmem:[%s5331_s12 + $0x8] sm:$0xff] %vm888_vm1, %v3920_v8  ;;  %v3923_v32 = vld [vmem:[#allocation5] sm:$0xff]  ;;  %3926 = vst.msk [vmem:[%s5336_s23 + $0x8] sm:$0xff] %vm888_vm1, %v3924_v52 }
 0x6bd   : > { %3921 = vst.msk [vmem:[%s5331_s12] sm:$0xff] %vm888_vm1, %v3919_v60  ;;  %3925 = vst.msk [vmem:[%s5336_s23] sm:$0xff] %vm888_vm1, %v3923_v32 }
 0x6be PF: > { %s6181_s2 = sld [smem:[#allocation17_spill]]  ;;  %s6182_s25 = sld [smem:[#allocation26_spill]] }
 0x6bf   : > { %s6184_s22 = sld [smem:[#allocation37_spill]]  ;;  %s3956_s12 = sshll.u32 %s5338_s21, 4  ;;  %s6003_s12 = int_to_ptr.vmem [resolvable:$true] %s3956_s12 }
 0x6c0   : > { %s4987_s24 = scalar_lea.vmem %s6003_s12, 1024  ;;  %s5115_s3 = smov [#allocation8]  }
 0x6c1   : > { %p4988_p1 = scmp.ne.s32.totalorder %s6003_s12, %s4987_s24  ;;  %s4991_s30 = sshll.u32 %s5115_s3, 4  ;;  %s4992_s30 = int_to_ptr.vmem [resolvable:$false] %s4991_s30 }
 0x6c2   : > { %s4993_s20 = scalar_lea.vmem %s4992_s30, 2048  ;;  %p4994_p5 = scmp.lt.s32.totalorder %s6003_s12, %s4992_s30 }
 0x6c3   : > { %p4989_p2 = pnand %p4988_p1, %p5271_p3  ;;  %p4995_p6 = scmp.lt.s32.totalorder %s4993_s20, %s4987_s24 }
 0x6c4   : > { %s4345_s15 = sshll.u32 %s6181_s2, 10  ;;  %s3928_s23 = scalar_lea.sflag [#allocation9], %s6182_s25 }
 0x6c5   : > { %s6185_s17 = smov %s6184_s22  ;;  %s6000_s1 = scalar_lea.hbm %s6184_s22, %s4345_s15 }
 0x6c6   : > { %p4990_p4 = pneg %p4989_p2  ;;  %p4996_p7 = por %p4995_p6, %p4994_p5 }
 0x6c8   : > { %p4997_p8 = pnand %p4996_p7, %p4990_p4 }
 0x6ca   : > { %5000 = shalt.err (!%p4997_p8)
}
 0x6cb   : > { %s5001_s21 = scalar_lea.hbm %s6000_s1, 1024  ;;  %s5005_s22 = scalar_lea.hbm %s6185_s17, 2048 }
 0x6cc   : > { %p5002_p10 = scmp.ne.s32.totalorder %s6000_s1, %s5001_s21  ;;  %p5006_p13 = scmp.lt.u32.totalorder %s6000_s1, %s6185_s17 }
 0x6cd   : > { %p5007_p0 = scmp.lt.u32.totalorder %s5005_s22, %s5001_s21  ;;  %p5009_p2 = scmp.lt.u32.totalorder %s5001_s21, %s6000_s1 }
 0x6ce   : > { %p5003_p11 = pnand %p5002_p10, %p5271_p3 }
 0x6cf   : > { %p5008_p1 = por %p5007_p0, %p5006_p13 }
 0x6d0   : > { %p5004_p12 = pneg %p5003_p11 }
 0x6d1   : > { %p5010_p4 = por %p5009_p2, %p5008_p1 }
 0x6d3   : > { %p5011_p5 = pnand %p5010_p4, %p5004_p12 }
 0x6d5   : > { %5014 = shalt.err (!%p5011_p5)
}
 0x6d6   : > { %s5116_s24 = smov 128   ;;  %s5117_s20 = smov 8  }
 0x6d7   : > { %4889 = dma.vmem_to_hbm [thread:$0]  (%p5271_p3), %s6003_s12, 1024, %s6000_s1, %s3928_s23, %s5116_s24, %s5116_s24, %s5117_s20  }
 0x6d8   : > { %s6186_s13 = sld [smem:[#allocation38_spill]]  ;;  %s3972_s3 = sshll.u32 %s5340_s16, 4  ;;  %s6040_s3 = int_to_ptr.vmem [resolvable:$true] %s3972_s3 }
 0x6d9   : > { %s3933_s30 = scalar_lea.sflag [#allocation11], %s6182_s25  ;;  %s5015_s0 = scalar_lea.vmem %s6040_s3, 1024 }
 0x6da   : > { %p5016_p6 = scmp.ne.s32.totalorder %s6040_s3, %s5015_s0  ;;  %s5118_s4 = smov [#allocation10]  }
 0x6db   : > { %s5019_s1 = sshll.u32 %s5118_s4, 4  ;;  %s5020_s1 = int_to_ptr.vmem [resolvable:$false] %s5019_s1 }
 0x6dc   : > { %p5017_p7 = pnand %p5016_p6, %p5271_p3  ;;  %s5021_s2 = scalar_lea.vmem %s5020_s1, 2048 }
 0x6dd   : > { %p5022_p10 = scmp.lt.s32.totalorder %s6040_s3, %s5020_s1  ;;  %p5023_p11 = scmp.lt.s32.totalorder %s5021_s2, %s5015_s0 }
 0x6de   : > { %s6037_s22 = scalar_lea.hbm %s6186_s13, %s4345_s15  ;;  %p5018_p8 = pneg %p5017_p7 }
 0x6df   : > { %p5024_p12 = por %p5023_p11, %p5022_p10 }
 0x6e1   : > { %p5025_p13 = pnand %p5024_p12, %p5018_p8 }
 0x6e3   : > { %5028 = shalt.err (!%p5025_p13)
}
 0x6e4   : > { %s5029_s16 = scalar_lea.hbm %s6037_s22, 1024  ;;  %s5033_s4 = scalar_lea.hbm %s6186_s13, 2048 }
 0x6e5   : > { %p5030_p0 = scmp.ne.s32.totalorder %s6037_s22, %s5029_s16  ;;  %p5034_p4 = scmp.lt.u32.totalorder %s6037_s22, %s6186_s13 }
 0x6e6   : > { %p5035_p5 = scmp.lt.u32.totalorder %s5033_s4, %s5029_s16  ;;  %p5037_p7 = scmp.lt.u32.totalorder %s5029_s16, %s6037_s22 }
 0x6e7   : > { %p5031_p1 = pnand %p5030_p0, %p5271_p3 }
 0x6e8   : > { %p5036_p6 = por %p5035_p5, %p5034_p4 }
 0x6e9   : > { %p5032_p2 = pneg %p5031_p1 }
 0x6ea   : > { %p5038_p8 = por %p5037_p7, %p5036_p6 }
 0x6ec   : > { %p5039_p10 = pnand %p5038_p8, %p5032_p2 }
 0x6ee   : > { %5042 = shalt.err (!%p5039_p10)
}
 0x6ef   : > { %4890 = dma.vmem_to_hbm [thread:$0]  (%p5271_p3), %s6040_s3, 1024, %s6037_s22, %s3933_s30, %s5116_s24, %s5116_s24, %s5117_s20  }
 0x6f0 PF: > { %s6187_s0 = sld [smem:[#allocation20_spill]]  ;;  %s6188_s9 = sld [smem:[#allocation14_spill]] }
 0x6f6   : > { %p4900_p11 = scmp.ge.s32.totalorder %s6187_s0, 2  ;;  %s3993_s2 = sand.u32 1, %s6188_s9  }
 0x6f7   : > { %s3994_s16 = scalar_lea.sflag [#allocation9], %s3993_s2 }
 0x6f8   : > { %p4894_p12 = pnand %p4900_p11, %p5281_p9 }
 0x6fa   : > { %5076 = dma.done.wait (!%p4894_p12), %s3994_s16, 1024  }
 0x6fb   : > { %5078 = vsyncadd (!%p4894_p12), %s3994_s16, 4294966272  ;;  %s4003_s14 = scalar_lea.sflag [#allocation11], %s3993_s2 }
 0x6fc   : > { %5080 = dma.done.wait (!%p4894_p12), %s4003_s14, 1024  }
 0x6fd   : > { %5082 = vsyncadd (!%p4894_p12), %s4003_s14, 4294966272  ;;  %s37_s3 = sadd.s32 1, %s6187_s0   ;;  %s6190_s21 = sld [smem:[#allocation15_spill]] }
 0x6fe   : > { %p34_p13 = scmp.ge.s32.totalorder %s37_s3, 18   ;;  %s6191_s1 = sld [smem:[#allocation16_spill]] }
 0x6ff   : > { %s6192_s22 = sld [smem:[#allocation25_spill]]  ;;  %s6193_s2 = sld [smem:[#allocation18_spill]] }
 0x700   : > { %s6194_s23 = sld [smem:[#allocation19_spill]]  ;;  %s6195_s24 = sld [smem:[#allocation21_spill]] }
 0x701   : > { %s6196_s25 = sld [smem:[#allocation23_spill]]  ;;  %36 = sbr.rel (!%p34_p13) target bundleno = 21 (0x15), region = 182 }
 0x708   :  { %4024 = vsyncpa [#allocation9], 1 }
 0x709   :  { %4026 = vsyncpa [#allocation9 + $0x1], 1 }
 0x70a   :  { %4027 = vsyncpa [#allocation11], 1 }
 0x70b   :  { %4029 = vsyncpa [#allocation11 + $0x1], 1 }

</bundles_post_ra>
